<compile_context>
chip_gen: v7x
topology: tpu7x:2x2x1
jax: 0.10.0
libtpu: 0.0.40
codegen_flags: <defaults>
</compile_context>

<pallas_src>
import functools
import math

import jax
import jax.numpy as jnp
from jax.experimental import pallas as pl
from jax.experimental.pallas import tpu as pltpu


CONV_CFG = [(3, 32, 1), (32, 64, 2), (64, 128, 2)]   # (Cin, Cout, stride), k=3 p=1
FEAT_DIM = 128


def _conv_dims(h, w, stride):
    """Output spatial dims and the padded-input dims the fused kernel expects."""
    ho = (h + 2 - 3) // stride + 1
    wo = (w + 2 - 3) // stride + 1
    hp = max(h + 2, stride * ho + 2)     # >= stride*ho + 2 so every tap slab fits
    wp = max(w + 2, stride * wo + 2)
    return ho, wo, hp, wp


# ------------------------- Pallas kernels -------------------------

def _accumulate_taps(x_ref, w_ref, *, ho, wo, stride):
    """3x3 conv on one padded NHWC image as a sum of 9 shifted matmuls."""
    cin = x_ref.shape[-1]
    cout = w_ref.shape[-1]
    x = x_ref[0]                                   # (Hp, Wp, Cin) bf16
    w = w_ref[...]                                 # (1, 9, Cin, Cout) bf16
    acc = jnp.zeros((ho * wo, cout), jnp.float32)
    for di in range(3):
        for dj in range(3):
            if stride == 1:
                tap = jax.lax.slice(x, (di, dj, 0), (di + ho, dj + wo, cin))
            else:
                s = stride
                slab = jax.lax.slice(
                    x, (di, dj, 0), (di + s * ho, dj + s * wo, cin))
                # static reshape + static index == stride-s subsample (no
                # strided loads needed, only stride-1 slices).
                tap = slab.reshape(ho, s, wo, s, cin)[:, 0, :, 0, :]
            acc += jnp.dot(tap.reshape(ho * wo, cin), w[0, 3 * di + dj],
                           preferred_element_type=jnp.float32)
    return acc


def _conv_relu_pad_kernel(x_ref, w_ref, b_ref, o_ref, *, ho, wo, stride):
    acc = _accumulate_taps(x_ref, w_ref, ho=ho, wo=wo, stride=stride)
    act = jnp.maximum(acc + b_ref[...][0], 0.0)               # bias + ReLU in f32
    out = act.astype(o_ref.dtype).reshape(1, ho, wo, -1)
    # Emit the activation already zero-padded for the next conv layer.
    o_ref[...] = jnp.zeros_like(o_ref)
    o_ref[:, 1:1 + ho, 1:1 + wo, :] = out


def _conv_gap_fc_kernel(x_ref, w_ref, b_ref, fcw_ref, fcb_ref, o_ref,
                        *, ho, wo, stride):
    acc = _accumulate_taps(x_ref, w_ref, ho=ho, wo=wo, stride=stride)
    act = jnp.maximum(acc + b_ref[...][0], 0.0)               # (Ho*Wo, Cout) f32
    pooled = jnp.mean(act, axis=0, keepdims=True)             # GAP -> (1, Cout)
    feat = jnp.dot(pooled.astype(jnp.bfloat16), fcw_ref[...][0],
                   preferred_element_type=jnp.float32) + fcb_ref[...][0]
    o_ref[...] = feat.reshape(1, 1, -1)


def _moco_head_kernel(q_ref, k_ref, queue_ref, pos_ref, neg_ref, kn_ref,
                      *, inv_t, eps):
    q = q_ref[...]
    qn = q * jax.lax.rsqrt(
        jnp.maximum(jnp.sum(q * q, axis=1, keepdims=True), eps * eps))

    @pl.when(pl.program_id(0) == 0)
    def _():
        k = k_ref[...]
        kn = k * jax.lax.rsqrt(
            jnp.maximum(jnp.sum(k * k, axis=1, keepdims=True), eps * eps))
        pos_ref[...] = inv_t * jax.lax.dot_general(
            qn, kn, (((1,), (1,)), ((), ())),
            preferred_element_type=jnp.float32)
        kn_ref[...] = kn

    neg_ref[...] = inv_t * jnp.dot(
        qn.astype(jnp.bfloat16), queue_ref[...].astype(jnp.bfloat16),
        preferred_element_type=jnp.float32)


# ------------------------- pallas_call wrappers -------------------------

def conv_relu_pad(x_pad, w2, b2, *, stride, ho, wo, hp_out, wp_out, per_set):
    n, hp, wp, cin = x_pad.shape
    cout = w2.shape[-1]
    kern = functools.partial(_conv_relu_pad_kernel, ho=ho, wo=wo, stride=stride)
    flops = 2 * n * ho * wo * 9 * cin * cout
    bytes_accessed = (x_pad.size * 2 + w2.size * 2 + b2.size * 4
                      + n * hp_out * wp_out * cout * 2)
    return pl.pallas_call(
        kern,
        out_shape=jax.ShapeDtypeStruct((n, hp_out, wp_out, cout), jnp.bfloat16),
        grid=(2, per_set),
        in_specs=[
            pl.BlockSpec((1, hp, wp, cin), lambda e, i: (e * per_set + i, 0, 0, 0)),
            pl.BlockSpec((1, 9, cin, cout), lambda e, i: (e, 0, 0, 0)),
            pl.BlockSpec((1, 1, cout), lambda e, i: (e, 0, 0)),
        ],
        out_specs=pl.BlockSpec((1, hp_out, wp_out, cout),
                               lambda e, i: (e * per_set + i, 0, 0, 0)),
        compiler_params=pltpu.CompilerParams(
            dimension_semantics=("parallel", "parallel")),
        cost_estimate=pl.CostEstimate(flops=flops, transcendentals=0,
                                      bytes_accessed=bytes_accessed),
    )(x_pad, w2, b2)


def conv_gap_fc(x_pad, w2, b2, fcw2, fcb2, *, stride, ho, wo, per_set):
    n, hp, wp, cin = x_pad.shape
    cout = w2.shape[-1]
    fdim = fcw2.shape[-1]
    kern = functools.partial(_conv_gap_fc_kernel, ho=ho, wo=wo, stride=stride)
    flops = 2 * n * (ho * wo * 9 * cin * cout + fdim * cout)
    bytes_accessed = (x_pad.size * 2 + w2.size * 2 + fcw2.size * 2
                      + (b2.size + fcb2.size) * 4 + n * fdim * 4)
    out = pl.pallas_call(
        kern,
        out_shape=jax.ShapeDtypeStruct((n, 1, fdim), jnp.float32),
        grid=(2, per_set),
        in_specs=[
            pl.BlockSpec((1, hp, wp, cin), lambda e, i: (e * per_set + i, 0, 0, 0)),
            pl.BlockSpec((1, 9, cin, cout), lambda e, i: (e, 0, 0, 0)),
            pl.BlockSpec((1, 1, cout), lambda e, i: (e, 0, 0)),
            pl.BlockSpec((1, fdim, fdim), lambda e, i: (e, 0, 0)),
            pl.BlockSpec((1, 1, fdim), lambda e, i: (e, 0, 0)),
        ],
        out_specs=pl.BlockSpec((1, 1, fdim), lambda e, i: (e * per_set + i, 0, 0)),
        compiler_params=pltpu.CompilerParams(
            dimension_semantics=("parallel", "parallel")),
        cost_estimate=pl.CostEstimate(flops=flops, transcendentals=0,
                                      bytes_accessed=bytes_accessed),
    )(x_pad, w2, b2, fcw2, fcb2)
    return out.reshape(n, fdim)


def moco_head(q_feat, k_feat, queue, temperature, *, queue_tile=4096):
    bsz, dim = q_feat.shape
    qlen = queue.shape[1]
    tq = qlen if qlen <= queue_tile else queue_tile
    assert qlen % tq == 0, "queue_length must be a multiple of the queue tile"
    kern = functools.partial(_moco_head_kernel,
                             inv_t=1.0 / temperature, eps=1e-12)
    flops = 2 * bsz * dim * (bsz + qlen)
    bytes_accessed = 4 * (2 * bsz * dim + dim * qlen
                          + bsz * bsz + bsz * qlen + bsz * dim)
    return pl.pallas_call(
        kern,
        out_shape=(jax.ShapeDtypeStruct((bsz, bsz), jnp.float32),
                   jax.ShapeDtypeStruct((bsz, qlen), jnp.float32),
                   jax.ShapeDtypeStruct((bsz, dim), jnp.float32)),
        grid=(qlen // tq,),
        in_specs=[pl.BlockSpec((bsz, dim), lambda i: (0, 0)),
                  pl.BlockSpec((bsz, dim), lambda i: (0, 0)),
                  pl.BlockSpec((dim, tq), lambda i: (0, i))],
        out_specs=(pl.BlockSpec((bsz, bsz), lambda i: (0, 0)),
                   pl.BlockSpec((bsz, tq), lambda i: (0, i)),
                   pl.BlockSpec((bsz, dim), lambda i: (0, 0))),
        compiler_params=pltpu.CompilerParams(
            dimension_semantics=("arbitrary",)),
        cost_estimate=pl.CostEstimate(flops=flops, transcendentals=0,
                                      bytes_accessed=bytes_accessed),
    )(q_feat, k_feat, queue)


# ------------------------- plain-JAX glue -------------------------

def pack_encoder_params(q_params, k_params):
    """Stack q/k encoder params on a leading axis of 2 in kernel layout."""
    packed = {}
    for i, (cin, cout, _) in enumerate(CONV_CFG):
        w = jnp.stack([q_params[f"conv{i}_w"], k_params[f"conv{i}_w"]])
        # (2, Cout, Cin, 3, 3) -> (2, kh, kw, Cin, Cout) -> (2, 9, Cin, Cout)
        w = jnp.transpose(w, (0, 3, 4, 2, 1)).reshape(2, 9, cin, cout)
        packed[f"conv{i}_w"] = w.astype(jnp.bfloat16)
        packed[f"conv{i}_b"] = jnp.stack(
            [q_params[f"conv{i}_b"], k_params[f"conv{i}_b"]]).reshape(2, 1, cout)
    fcw = jnp.stack([q_params["fc_w"].T, k_params["fc_w"].T])    # (2, in, out)
    packed["fc_w"] = fcw.astype(jnp.bfloat16)
    packed["fc_b"] = jnp.stack(
        [q_params["fc_b"], k_params["fc_b"]]).reshape(2, 1, FEAT_DIM)
    return packed


def batched_encoder_forward(packed, x_nchw):
    """Base encoder; rows [0,B) use weight set 0 (q), [B,2B) use set 1 (k)."""
    n = x_nchw.shape[0]
    assert n % 2 == 0
    per_set = n // 2
    x = jnp.transpose(x_nchw, (0, 2, 3, 1)).astype(jnp.bfloat16)   # NCHW -> NHWC
    h, w = x.shape[1], x.shape[2]
    _, _, hp0, wp0 = _conv_dims(h, w, CONV_CFG[0][2])
    x = jnp.pad(x, ((0, 0), (1, hp0 - h - 1), (1, wp0 - w - 1), (0, 0)))
    for i, (_, _, stride) in enumerate(CONV_CFG):
        ho, wo, _, _ = _conv_dims(h, w, stride)
        if i + 1 < len(CONV_CFG):
            _, _, hp_out, wp_out = _conv_dims(ho, wo, CONV_CFG[i + 1][2])
            x = conv_relu_pad(x, packed[f"conv{i}_w"], packed[f"conv{i}_b"],
                              stride=stride, ho=ho, wo=wo,
                              hp_out=hp_out, wp_out=wp_out, per_set=per_set)
            h, w = ho, wo
        else:
            return conv_gap_fc(x, packed[f"conv{i}_w"], packed[f"conv{i}_b"],
                               packed["fc_w"], packed["fc_b"],
                               stride=stride, ho=ho, wo=wo, per_set=per_set)


def init_encoder_params(key):
    params = {}
    keys = jax.random.split(key, 2 * len(CONV_CFG) + 2)
    ki = 0
    for i, (cin, cout, _) in enumerate(CONV_CFG):
        bound = 1.0 / math.sqrt(cin * 9)
        params[f"conv{i}_w"] = jax.random.uniform(
            keys[ki], (cout, cin, 3, 3), jnp.float32, -bound, bound); ki += 1
        params[f"conv{i}_b"] = jax.random.uniform(
            keys[ki], (cout,), jnp.float32, -bound, bound); ki += 1
    bound = 1.0 / math.sqrt(FEAT_DIM)
    params["fc_w"] = jax.random.uniform(
        keys[ki], (FEAT_DIM, FEAT_DIM), jnp.float32, -bound, bound); ki += 1
    params["fc_b"] = jax.random.uniform(
        keys[ki], (FEAT_DIM,), jnp.float32, -bound, bound)
    return params


def moco_forward(state, x, others):
    q_params, k_params = state["q"], state["k"]
    queue, ptr = state["queue"], state["ptr"]
    m, temp, qlen = state["m"], state["T"], state["queue_length"]

    # Momentum update of the key encoder before its forward pass (verbatim
    # from the provided module: k <- q*m + k*(1-m)).
    new_k_params = jax.tree_util.tree_map(
        lambda qp, kp: qp * m + kp * (1.0 - m), q_params, k_params)

    # Both encoder passes in one batched launch (stacked weight sets).
    packed = pack_encoder_params(q_params, new_k_params)
    feats = batched_encoder_forward(packed, jnp.concatenate([x, others], axis=0))

    bsz = x.shape[0]
    q_feat = feats[:bsz]
    k_feat = jax.lax.stop_gradient(feats[bsz:])        # torch.no_grad() branch

    pos, neg, kn = moco_head(q_feat, k_feat, queue, temp)
    logits = jnp.concatenate([pos, neg], axis=1)
    labels = jnp.zeros((logits.shape[0],), dtype=jnp.int32)   # torch.long -> int32

    # dequeue_enqueue (tiny buffer update, kept in JAX)
    # TODO(synk): could be folded into the head kernel via input_output_aliases
    # to write kn directly into queue[:, ptr:ptr+bsz] without a full-queue copy.
    new_queue = jax.lax.dynamic_update_slice(queue, kn.T, (0, ptr))
    new_ptr = (ptr + bsz) % qlen

    new_state = dict(state, k=new_k_params, queue=new_queue, ptr=new_ptr)
    return (logits, labels), new_state


if __name__ == "__main__":
    key = jax.random.PRNGKey(0)
    key_params, key_x, key_o, key_queue = jax.random.split(key, 4)

    B, C, H, W = 2, 3, 16, 16
    QUEUE_LEN = 64                     # small synthetic stand-in for 32768

    q_params = init_encoder_params(key_params)
    # key encoder initialized as a copy of the query encoder (MoCo.__init__)
    k_params = jax.tree_util.tree_map(lambda p: p, q_params)

    queue = jax.random.normal(key_queue, (FEAT_DIM, QUEUE_LEN), jnp.float32)
    queue = queue / jnp.maximum(
        jnp.linalg.norm(queue, axis=0, keepdims=True), 1e-12)

    state = dict(q=q_params, k=k_params, queue=queue, ptr=0,
                 m=0.999, T=0.7, queue_length=QUEUE_LEN)

    x = jax.random.normal(key_x, (B, C, H, W), jnp.float32)
    others = jax.random.normal(key_o, (B, C, H, W), jnp.float32)

    (logits, labels), state = moco_forward(state, x, others)
    jax.block_until_ready((logits, labels, state["queue"]))

    assert logits.shape == (B, B + QUEUE_LEN)
    assert labels.shape == (B,)
    assert state["queue"].shape == (FEAT_DIM, QUEUE_LEN)
    print("KERNEL_OK")
</pallas_src>

<mosaic_0001>
module attributes {stable_mosaic.version = 11 : i64} {
  func.func @_conv_relu_pad_kernel(%arg0: i32, %arg1: i32, %arg2: memref<1x18x18x3xbf16, #tpu.memory_space<vmem>>, %arg3: memref<1x9x3x32xbf16, #tpu.memory_space<vmem>>, %arg4: memref<1x1x32xf32, #tpu.memory_space<vmem>>, %arg5: memref<1x18x18x32xbf16, #tpu.memory_space<vmem>>) attributes {dimension_semantics = [#tpu.dimension_semantics<parallel>, #tpu.dimension_semantics<parallel>], iteration_bounds = array<i64: 2, 2>, scalar_prefetch = 0 : i64, scratch_operands = 0 : i64, tpu.core_type = #tpu.core_type<tc>, window_params = [{transform_indices = @transform_0, window_bounds = array<i64: 1, 18, 18, 3>}, {transform_indices = @transform_1, window_bounds = array<i64: 1, 9, 3, 32>}, {transform_indices = @transform_2, window_bounds = array<i64: 1, 1, 32>}, {transform_indices = @transform_3, window_bounds = array<i64: 1, 18, 18, 32>}]} {
    %c0 = arith.constant 0 : index
    %c0_0 = arith.constant 0 : index
    %c0_1 = arith.constant 0 : index
    %c0_2 = arith.constant 0 : index
    %0 = vector.load %arg2[%c0, %c0_0, %c0_1, %c0_2] : memref<1x18x18x3xbf16, #tpu.memory_space<vmem>>, vector<1x18x18x3xbf16>
    %1 = vector.shape_cast %0 : vector<1x18x18x3xbf16> to vector<18x18x3xbf16>
    %c0_3 = arith.constant 0 : index
    %c0_4 = arith.constant 0 : index
    %c0_5 = arith.constant 0 : index
    %c0_6 = arith.constant 0 : index
    %2 = vector.load %arg3[%c0_3, %c0_4, %c0_5, %c0_6] : memref<1x9x3x32xbf16, #tpu.memory_space<vmem>>, vector<1x9x3x32xbf16>
    %cst = arith.constant 0.000000e+00 : f32
    %3 = vector.broadcast %cst : f32 to vector<256x32xf32>
    %4 = vector.extract_strided_slice %1 {offsets = [0, 0, 0], sizes = [16, 16, 3], strides = [1, 1, 1]} : vector<18x18x3xbf16> to vector<16x16x3xbf16>
    %5 = vector.shape_cast %4 : vector<16x16x3xbf16> to vector<256x3xbf16>
    %6 = vector.extract_strided_slice %2 {offsets = [0, 0, 0, 0], sizes = [1, 1, 3, 32], strides = [1, 1, 1, 1]} : vector<1x9x3x32xbf16> to vector<1x1x3x32xbf16>
    %7 = vector.shape_cast %6 : vector<1x1x3x32xbf16> to vector<3x32xbf16>
    %cst_7 = arith.constant dense<0.000000e+00> : vector<256x32xf32>
    %8 = tpu.matmul %5, %7, %cst_7 {dimension_numbers = #tpu.dot_dimension_numbers<[1], [0], [0], [1], [0, 0, 1, 1], [], []>} : vector<256x3xbf16>, vector<3x32xbf16>, vector<256x32xf32> -> vector<256x32xf32>
    %9 = arith.addf %3, %8 : vector<256x32xf32>
    %10 = vector.extract_strided_slice %1 {offsets = [0, 1, 0], sizes = [16, 16, 3], strides = [1, 1, 1]} : vector<18x18x3xbf16> to vector<16x16x3xbf16>
    %11 = vector.shape_cast %10 : vector<16x16x3xbf16> to vector<256x3xbf16>
    %12 = vector.extract_strided_slice %2 {offsets = [0, 1, 0, 0], sizes = [1, 1, 3, 32], strides = [1, 1, 1, 1]} : vector<1x9x3x32xbf16> to vector<1x1x3x32xbf16>
    %13 = vector.shape_cast %12 : vector<1x1x3x32xbf16> to vector<3x32xbf16>
    %cst_8 = arith.constant dense<0.000000e+00> : vector<256x32xf32>
    %14 = tpu.matmul %11, %13, %cst_8 {dimension_numbers = #tpu.dot_dimension_numbers<[1], [0], [0], [1], [0, 0, 1, 1], [], []>} : vector<256x3xbf16>, vector<3x32xbf16>, vector<256x32xf32> -> vector<256x32xf32>
    %15 = arith.addf %9, %14 : vector<256x32xf32>
    %16 = vector.extract_strided_slice %1 {offsets = [0, 2, 0], sizes = [16, 16, 3], strides = [1, 1, 1]} : vector<18x18x3xbf16> to vector<16x16x3xbf16>
    %17 = vector.shape_cast %16 : vector<16x16x3xbf16> to vector<256x3xbf16>
    %18 = vector.extract_strided_slice %2 {offsets = [0, 2, 0, 0], sizes = [1, 1, 3, 32], strides = [1, 1, 1, 1]} : vector<1x9x3x32xbf16> to vector<1x1x3x32xbf16>
    %19 = vector.shape_cast %18 : vector<1x1x3x32xbf16> to vector<3x32xbf16>
    %cst_9 = arith.constant dense<0.000000e+00> : vector<256x32xf32>
    %20 = tpu.matmul %17, %19, %cst_9 {dimension_numbers = #tpu.dot_dimension_numbers<[1], [0], [0], [1], [0, 0, 1, 1], [], []>} : vector<256x3xbf16>, vector<3x32xbf16>, vector<256x32xf32> -> vector<256x32xf32>
    %21 = arith.addf %15, %20 : vector<256x32xf32>
    %22 = vector.extract_strided_slice %1 {offsets = [1, 0, 0], sizes = [16, 16, 3], strides = [1, 1, 1]} : vector<18x18x3xbf16> to vector<16x16x3xbf16>
    %23 = vector.shape_cast %22 : vector<16x16x3xbf16> to vector<256x3xbf16>
    %24 = vector.extract_strided_slice %2 {offsets = [0, 3, 0, 0], sizes = [1, 1, 3, 32], strides = [1, 1, 1, 1]} : vector<1x9x3x32xbf16> to vector<1x1x3x32xbf16>
    %25 = vector.shape_cast %24 : vector<1x1x3x32xbf16> to vector<3x32xbf16>
    %cst_10 = arith.constant dense<0.000000e+00> : vector<256x32xf32>
    %26 = tpu.matmul %23, %25, %cst_10 {dimension_numbers = #tpu.dot_dimension_numbers<[1], [0], [0], [1], [0, 0, 1, 1], [], []>} : vector<256x3xbf16>, vector<3x32xbf16>, vector<256x32xf32> -> vector<256x32xf32>
    %27 = arith.addf %21, %26 : vector<256x32xf32>
    %28 = vector.extract_strided_slice %1 {offsets = [1, 1, 0], sizes = [16, 16, 3], strides = [1, 1, 1]} : vector<18x18x3xbf16> to vector<16x16x3xbf16>
    %29 = vector.shape_cast %28 : vector<16x16x3xbf16> to vector<256x3xbf16>
    %30 = vector.extract_strided_slice %2 {offsets = [0, 4, 0, 0], sizes = [1, 1, 3, 32], strides = [1, 1, 1, 1]} : vector<1x9x3x32xbf16> to vector<1x1x3x32xbf16>
    %31 = vector.shape_cast %30 : vector<1x1x3x32xbf16> to vector<3x32xbf16>
    %cst_11 = arith.constant dense<0.000000e+00> : vector<256x32xf32>
    %32 = tpu.matmul %29, %31, %cst_11 {dimension_numbers = #tpu.dot_dimension_numbers<[1], [0], [0], [1], [0, 0, 1, 1], [], []>} : vector<256x3xbf16>, vector<3x32xbf16>, vector<256x32xf32> -> vector<256x32xf32>
    %33 = arith.addf %27, %32 : vector<256x32xf32>
    %34 = vector.extract_strided_slice %1 {offsets = [1, 2, 0], sizes = [16, 16, 3], strides = [1, 1, 1]} : vector<18x18x3xbf16> to vector<16x16x3xbf16>
    %35 = vector.shape_cast %34 : vector<16x16x3xbf16> to vector<256x3xbf16>
    %36 = vector.extract_strided_slice %2 {offsets = [0, 5, 0, 0], sizes = [1, 1, 3, 32], strides = [1, 1, 1, 1]} : vector<1x9x3x32xbf16> to vector<1x1x3x32xbf16>
    %37 = vector.shape_cast %36 : vector<1x1x3x32xbf16> to vector<3x32xbf16>
    %cst_12 = arith.constant dense<0.000000e+00> : vector<256x32xf32>
    %38 = tpu.matmul %35, %37, %cst_12 {dimension_numbers = #tpu.dot_dimension_numbers<[1], [0], [0], [1], [0, 0, 1, 1], [], []>} : vector<256x3xbf16>, vector<3x32xbf16>, vector<256x32xf32> -> vector<256x32xf32>
    %39 = arith.addf %33, %38 : vector<256x32xf32>
    %40 = vector.extract_strided_slice %1 {offsets = [2, 0, 0], sizes = [16, 16, 3], strides = [1, 1, 1]} : vector<18x18x3xbf16> to vector<16x16x3xbf16>
    %41 = vector.shape_cast %40 : vector<16x16x3xbf16> to vector<256x3xbf16>
    %42 = vector.extract_strided_slice %2 {offsets = [0, 6, 0, 0], sizes = [1, 1, 3, 32], strides = [1, 1, 1, 1]} : vector<1x9x3x32xbf16> to vector<1x1x3x32xbf16>
    %43 = vector.shape_cast %42 : vector<1x1x3x32xbf16> to vector<3x32xbf16>
    %cst_13 = arith.constant dense<0.000000e+00> : vector<256x32xf32>
    %44 = tpu.matmul %41, %43, %cst_13 {dimension_numbers = #tpu.dot_dimension_numbers<[1], [0], [0], [1], [0, 0, 1, 1], [], []>} : vector<256x3xbf16>, vector<3x32xbf16>, vector<256x32xf32> -> vector<256x32xf32>
    %45 = arith.addf %39, %44 : vector<256x32xf32>
    %46 = vector.extract_strided_slice %1 {offsets = [2, 1, 0], sizes = [16, 16, 3], strides = [1, 1, 1]} : vector<18x18x3xbf16> to vector<16x16x3xbf16>
    %47 = vector.shape_cast %46 : vector<16x16x3xbf16> to vector<256x3xbf16>
    %48 = vector.extract_strided_slice %2 {offsets = [0, 7, 0, 0], sizes = [1, 1, 3, 32], strides = [1, 1, 1, 1]} : vector<1x9x3x32xbf16> to vector<1x1x3x32xbf16>
    %49 = vector.shape_cast %48 : vector<1x1x3x32xbf16> to vector<3x32xbf16>
    %cst_14 = arith.constant dense<0.000000e+00> : vector<256x32xf32>
    %50 = tpu.matmul %47, %49, %cst_14 {dimension_numbers = #tpu.dot_dimension_numbers<[1], [0], [0], [1], [0, 0, 1, 1], [], []>} : vector<256x3xbf16>, vector<3x32xbf16>, vector<256x32xf32> -> vector<256x32xf32>
    %51 = arith.addf %45, %50 : vector<256x32xf32>
    %52 = vector.extract_strided_slice %1 {offsets = [2, 2, 0], sizes = [16, 16, 3], strides = [1, 1, 1]} : vector<18x18x3xbf16> to vector<16x16x3xbf16>
    %53 = vector.shape_cast %52 : vector<16x16x3xbf16> to vector<256x3xbf16>
    %54 = vector.extract_strided_slice %2 {offsets = [0, 8, 0, 0], sizes = [1, 1, 3, 32], strides = [1, 1, 1, 1]} : vector<1x9x3x32xbf16> to vector<1x1x3x32xbf16>
    %55 = vector.shape_cast %54 : vector<1x1x3x32xbf16> to vector<3x32xbf16>
    %cst_15 = arith.constant dense<0.000000e+00> : vector<256x32xf32>
    %56 = tpu.matmul %53, %55, %cst_15 {dimension_numbers = #tpu.dot_dimension_numbers<[1], [0], [0], [1], [0, 0, 1, 1], [], []>} : vector<256x3xbf16>, vector<3x32xbf16>, vector<256x32xf32> -> vector<256x32xf32>
    %57 = arith.addf %51, %56 : vector<256x32xf32>
    %c0_16 = arith.constant 0 : index
    %c0_17 = arith.constant 0 : index
    %c0_18 = arith.constant 0 : index
    %58 = vector.load %arg4[%c0_16, %c0_17, %c0_18] : memref<1x1x32xf32, #tpu.memory_space<vmem>>, vector<1x1x32xf32>
    %59 = vector.shape_cast %58 : vector<1x1x32xf32> to vector<1x32xf32>
    %60 = vector.broadcast %59 : vector<1x32xf32> to vector<256x32xf32>
    %61 = arith.addf %57, %60 : vector<256x32xf32>
    %cst_19 = arith.constant 0.000000e+00 : f32
    %62 = vector.broadcast %cst_19 : f32 to vector<256x32xf32>
    %63 = arith.maximumf %61, %62 : vector<256x32xf32>
    %64 = arith.truncf %63 : vector<256x32xf32> to vector<256x32xbf16>
    %65 = vector.shape_cast %64 : vector<256x32xbf16> to vector<1x16x16x32xbf16>
    %cst_20 = arith.constant 0.000000e+00 : bf16
    %66 = vector.broadcast %cst_20 : bf16 to vector<1x18x18x32xbf16>
    %c0_21 = arith.constant 0 : index
    %c0_22 = arith.constant 0 : index
    %c0_23 = arith.constant 0 : index
    %c0_24 = arith.constant 0 : index
    %67 = vector.load %arg5[%c0_21, %c0_22, %c0_23, %c0_24] : memref<1x18x18x32xbf16, #tpu.memory_space<vmem>>, vector<1x18x18x32xbf16>
    tpu.vector_store %arg5[%c0_21, %c0_22, %c0_23, %c0_24], %66 {strides = array<i32>} : memref<1x18x18x32xbf16, #tpu.memory_space<vmem>>, vector<1x18x18x32xbf16>,
    %c0_25 = arith.constant 0 : index
    %c1 = arith.constant 1 : index
    %c1_26 = arith.constant 1 : index
    %c0_27 = arith.constant 0 : index
    %68 = vector.load %arg5[%c0_25, %c1, %c1_26, %c0_27] : memref<1x18x18x32xbf16, #tpu.memory_space<vmem>>, vector<1x16x16x32xbf16>
    tpu.vector_store %arg5[%c0_25, %c1, %c1_26, %c0_27], %65 {strides = array<i32>} : memref<1x18x18x32xbf16, #tpu.memory_space<vmem>>, vector<1x16x16x32xbf16>,
    return
  }
  func.func @transform_0(%arg0: i32, %arg1: i32) -> (i32, i32, i32, i32) {
    %c2_i32 = arith.constant 2 : i32
    %0 = arith.muli %arg0, %c2_i32 : i32
    %1 = arith.addi %0, %arg1 : i32
    %c0_i32 = arith.constant 0 : i32
    %c0_i32_0 = arith.constant 0 : i32
    %c0_i32_1 = arith.constant 0 : i32
    %c0_i32_2 = arith.constant 0 : i32
    return %1, %c0_i32, %c0_i32_0, %c0_i32_1 : i32, i32, i32, i32
  }
  func.func @transform_1(%arg0: i32, %arg1: i32) -> (i32, i32, i32, i32) {
    %c0_i32 = arith.constant 0 : i32
    %c0_i32_0 = arith.constant 0 : i32
    %c0_i32_1 = arith.constant 0 : i32
    %c0_i32_2 = arith.constant 0 : i32
    return %arg0, %c0_i32, %c0_i32_0, %c0_i32_1 : i32, i32, i32, i32
  }
  func.func @transform_2(%arg0: i32, %arg1: i32) -> (i32, i32, i32) {
    %c0_i32 = arith.constant 0 : i32
    %c0_i32_0 = arith.constant 0 : i32
    %c0_i32_1 = arith.constant 0 : i32
    return %arg0, %c0_i32, %c0_i32_0 : i32, i32, i32
  }
  func.func @transform_3(%arg0: i32, %arg1: i32) -> (i32, i32, i32, i32) {
    %c2_i32 = arith.constant 2 : i32
    %0 = arith.muli %arg0, %c2_i32 : i32
    %1 = arith.addi %0, %arg1 : i32
    %c0_i32 = arith.constant 0 : i32
    %c0_i32_0 = arith.constant 0 : i32
    %c0_i32_1 = arith.constant 0 : i32
    %c0_i32_2 = arith.constant 0 : i32
    return %1, %c0_i32, %c0_i32_0, %c0_i32_1 : i32, i32, i32, i32
  }
}

</mosaic_0001>

<bundles_post_ra>
// kernel: tpu_custom_call.1
= control target key start
LH: loop header
LB: loop body
LE: loop exit
PB: predicated region body
PF: predicated region fallthrough
CT: control target
= control target key end

     0   :  { %s4931_s12 = smov 0   ;;  %s4933_s13 = smov 0   ;;  %s6392_s0 = inlined_call_operand.vmem [shape: bf16[4,18,18,3], index: 0, kind: input, shape index: {}]   ;;  %s6393_s1 = inlined_call_operand.vmem [shape: bf16[2,9,3,32], index: 1, kind: input, shape index: {}]   ;;  %s6394_s2 = inlined_call_operand.vmem [shape: f32[2,1,32], index: 2, kind: input, shape index: {}]   ;;  %s6395_s3 = inlined_call_operand.vmem [shape: bf16[4,18,18,32], index: 3, kind: output, shape index: {}]  }
   0x1   :  { %s4935_s14 = smov 0   ;;  %s4937_s15 = smov 0  }
   0x2   :  { %s4939_s16 = smov 0  }
   0x3 LB: > { %s22_s17 = sadd.s32 1, %s4899_s14  ;;  %s25_s18 = sadd.s32 1, %s4903_s15  ;;  %s4907_s16 = sphi %s4939_s16, %s13_s16   ;;  %s4903_s15 = sphi %s4937_s15, %s6486_s15   ;;  %s4899_s14 = sphi %s4935_s14, %s6485_s14   ;;  %s4895_s13 = sphi %s4933_s13, %s6484_s13   ;;  %s4891_s12 = sphi %s4931_s12, %s6483_s12  }
   0x4   : > { %p23_p0 = scmp.ge.s32.totalorder %s22_s17, 2  ;;  %p3718_p1 = scmp.ge.s32.totalorder %s4907_s16, 1 }
   0x5   : > { %p179_p2 = scmp.lt.s32.totalorder %s4907_s16, 5 }
   0x6   : > { %s6488_s17 = smov (%p23_p0, %s22_s17), 0  ;;  %s6490_s18 = smov (!%p23_p0, %s25_s18), %s4903_s15 }
   0x7   : > { %p180_p3 = pnand %p3718_p1, %p179_p2  ;;  %p27_p4 = scmp.ge.s32.totalorder %s6490_s18, 2 }
   0x9   : > { %s6492_s18 = smov (%p27_p4, %s6490_s18), 0  ;;  %183 = sbr.rel (%p180_p3) target bundleno = 587 (0x24b), region = 32 }
  0x10   : > { %p224_p5 = scmp.lt.s32.totalorder %s4895_s13, 1  ;;  %vm789_vm0 = vcmask 1040384   ;;  %s3719_s19 = sshll.u32 %s4895_s13, 1  ;;  %vm790_vm1 = vcmask 1041408   ;;  %v4909_v0 = vmov 65535   ;;  %vm740_vm4 = vcmask 23552  }
  0x11   : > { %s216_s20 = sadd.s32 %s4891_s12, %s3719_s19  ;;  %v791_v1 = vsel %vm789_vm0, 4294967295, %v4909_v0  ;;  %vm305_vm2 = vsmask.f32 3328  ;;  %vm306_vm3 = vsmask.f32 7440  ;;  %vm1265_vm6 = vcmask 1042432  }
  0x12   : > { %s6494_s13 = smov (!%p224_p5, %s4895_s13), 1  ;;  %p217_p6 = scmp.lt.s32.totalorder %s216_s20, 3  ;;  %v4964_v2 = vsel %vm790_vm1, %v791_v1, 0  ;;  %vm5041_vm5 = vmor %vm305_vm2, %vm306_vm3  ;;  %vm1266_vm7 = vcmask 1046532   ;;  %vm3039_vm9 = vcmask 257024   ;;  %vm3042_vm10 = vcmask 253952  }
  0x13   : > { %s4805_s21 = smul.u32 18, %s6494_s13  ;;  %vm5215_vm8 = vmor %vm1265_vm6, %vm1266_vm7  ;;  %s231_s7 = scalar_lea.vmem %s6394_s2, %s6494_s13  ;;  %vm3500_vm11 = vsmask.f32 7938  ;;  %vm3175_vm12 = vsmask.f32 256 }
  0x14   : > { %s6496_s20 = smov (!%p217_p6, %s216_s20), 3  ;;  %vm3176_vm13 = vsmask.f32 4368  ;;  %vm6046_vm14 = vmand %vm3039_vm9, %vm3500_vm11 }
  0x15   : > { %s4971_s24 = scalar_lea.vmem %s6393_s1, %s4805_s21  ;;  %s4804_s25 = smul.u32 216, %s6496_s20  ;;  %vm6055_vm15 = vmor %vm3175_vm12, %vm3176_vm13 }
  0x16   : > { %v297_v3 = vld [vmem:[%s4971_s24 + $0x2] sm:$0x3]  ;;  %v300_v4 = vld [vmem:[%s4971_s24 + $0x8] sm:$0x3]  ;;  %v296_v7 = vld [vmem:[%s4971_s24] sm:$0x3] }
  0x17   : > { %v794_v5 = vand.u32 %v4964_v2, %v297_v3  ;;  %v4978_v6 = vand.u32 %v4964_v2, %v300_v4  ;;  %v301_v8 = vld [vmem:[%s4971_s24 + $0xa] sm:$0x3]  ;;  %s4987_s28 = scalar_lea.vmem %s6392_s0, %s4804_s25  ;;  %v4990_v9 = vand.u32 %v4964_v2, %v296_v7  ;;  %v302_v11 = vld [vmem:[%s4971_s24 + $0xc] sm:$0x3]  ;;  %v298_v12 = vld [vmem:[%s4971_s24 + $0x4] sm:$0x3]  ;;  %s5903_s4 = scalar_lea.vmem %s6395_s3, %s4804_s25 }
  0x18   : > { %v4993_v10 = vand.u32 %v4964_v2, %v301_v8  ;;  %v303_v13 = vld [vmem:[%s4971_s24 + $0xe] sm:$0x3]  ;;  %v5000_v14 = vld [vmem:[%s4987_s28] sm:$0xf]  ;;  %v5003_v15 = vld [vmem:[%s4987_s28 + $0x4] sm:$0xf]  ;;  %v5023_v25 = vand.u32 %v4964_v2, %v302_v11  ;;  %v5026_v26 = vand.u32 %v4964_v2, %v298_v12 }
  0x19   : > { %6429 = vst [vmem:[#allocation2_spill] sm:$0xff] %v4978_v6  ;;  %4240 = vmatprep.subr.bf16.mxu1 %v794_v5  ;;  %4376 = vmatprep.subr.bf16.mxu0 %v4978_v6  ;;  %v244_v16 = vld [vmem:[%s4987_s28 + $0x8] sm:$0x1]  ;;  %v309_v17 = vshrl.u32 %v5000_v14, 16  ;;  %v312_v18 = vshll.u32 %v5000_v14, 16  ;;  %v318_v19 = vshll.u32 %v5003_v15, 16  ;;  %v5029_v27 = vand.u32 %v4964_v2, %v303_v13  ;;  %vm6061_vm0 = vmand %vm3042_vm10, %vm3175_vm12 }
  0x1a   : > { %4241 = vmatpush3.bf16.msra.mxu1 %v794_v5  ;;  %4377 = vmatpush3.bf16.msra.mxu0 %v4978_v6  ;;  %v322_v20 = vshrl.u32 %v5003_v15, 16  ;;  %v5012_v21 = vld [vmem:[%s4987_s28 + $0xc] sm:$0xf]  ;;  %v328_v22 = vshll.u32 %v244_v16, 16  ;;  %v5016_v23 = vld [vmem:[%s4987_s28 + $0x10] sm:$0xf] }
  0x1b   : > { %4274 = vmatprep.subr.bf16.mxu1 %v4990_v9  ;;  %v5019_v24 = vld [vmem:[%s4987_s28 + $0x14] sm:$0x1]  ;;  %4410 = vmatprep.subr.bf16.mxu0 %v4993_v10  ;;  %6430 = vst [vmem:[#allocation3_spill] sm:$0xff] %v5029_v27  ;;  %v311_v28 = vrot.slane %v309_v17, 4  ;;  %v314_v29 = vrot.slane %v312_v18, 5  ;;  %v320_v30 = vrot.slane %v318_v19, 5  ;;  %v5047_v45 = vcombine.low %v5012_v21, %v5016_v23 }
  0x1c   : > { %v324_v31 = vrot.slane %v322_v20, 4  ;;  %v330_v32 = vrot.slane %v328_v22, 5  ;;  %v333_v33 = vshrl.u32 %v5012_v21, 16  ;;  %v336_v34 = vshll.u32 %v5012_v21, 16  ;;  %v5037_v40 = vld [vmem:[%s4987_s28 + $0x18] sm:$0xf] }
  0x1d   : > { %v342_v35 = vshll.u32 %v5016_v23, 16  ;;  %v315_v36 = vor.u32 %v314_v29, %v311_v28  ;;  %v346_v38 = vshrl.u32 %v5016_v23, 16  ;;  %v352_v39 = vshll.u32 %v5019_v24, 16  ;;  %v5050_v46 = vld [vmem:[%s4987_s28 + $0x1c] sm:$0xf] }
  0x1e   : > { %v325_v37 = vor.u32 %v324_v31, %v320_v30  ;;  %v335_v42 = vrot.slane %v333_v33, 4  ;;  %v338_v43 = vrot.slane %v336_v34, 5  ;;  %v1280_v52 = vrot.slane %v5019_v24, 5  ;;  %v5054_v53 = vld [vmem:[%s4987_s28 + $0x20] sm:$0x1] }
  0x1f   : > { %v344_v44 = vrot.slane %v342_v35, 5  ;;  %v316_v47 = vrot.slane %v315_v36, 4  ;;  %v348_v49 = vrot.slane %v346_v38, 4  ;;  %v354_v50 = vrot.slane %v352_v39, 5  ;;  %v5064_v0 = vld [vmem:[%s4987_s28 + $0x24] sm:$0xf] }
  0x20   : > { %v326_v48 = vrot.slane %v325_v37, 4  ;;  %v339_v51 = vor.u32 %v338_v43, %v335_v42  ;;  %v357_v54 = vshrl.u32 %v5037_v40, 16  ;;  %v360_v55 = vshll.u32 %v5037_v40, 16  ;;  %v5069_v7 = vld [vmem:[%s4987_s28 + $0x28] sm:$0xf] }
  0x21   : > { %v321_v56 = vsel %vm5041_vm5, %v316_v47, %v320_v30  ;;  %v349_v58 = vor.u32 %v348_v49, %v344_v44  ;;  %v366_v59 = vshll.u32 %v5050_v46, 16  ;;  %v370_v4 = vshrl.u32 %v5050_v46, 16  ;;  %v5077_v16 = vld [vmem:[%s4987_s28 + $0x2c] sm:$0x1]  ;;  %v5083_v22 = vld [vmem:[%s4987_s28 + $0x30] sm:$0xf] }
  0x22   : > { %v331_v57 = vsel %vm5041_vm5, %v326_v48, %v330_v32  ;;  %v340_v61 = vrot.slane %v339_v51, 4  ;;  %v359_v62 = vrot.slane %v357_v54, 4  ;;  %v362_v63 = vrot.slane %v360_v55, 5  ;;  %v5090_v36 = vld [vmem:[%s4987_s28 + $0x34] sm:$0xf] }
  0x23   : > { %v3724_v60 = vcombine.low %v321_v56, %v331_v57  ;;  %v350_v1 = vrot.slane %v349_v58, 4  ;;  %v368_v3 = vrot.slane %v366_v59, 5  ;;  %v376_v5 = vshll.u32 %v5054_v53, 16  ;;  %v5097_v42 = vld [vmem:[%s4987_s28 + $0x38] sm:$0x1] }
  0x24   : > { %v345_v8 = vsel %vm5041_vm5, %v340_v61, %v344_v44  ;;  %v363_v11 = vor.u32 %v362_v63, %v359_v62  ;;  %v1284_v12 = vrot.slane %v5050_v46, 5  ;;  %v1287_v13 = vrot.slane %v5054_v53, 5  ;;  %v5105_v56 = vld [vmem:[%s4987_s28 + $0x3c] sm:$0xf] }
  0x25   : > { %4242 = vmatprep.mubr.msk.bf16.mxu1 %vm740_vm4, %v3724_v60  ;;  %v355_v17 = vsel %vm5041_vm5, %v350_v1, %v354_v50  ;;  %v372_v18 = vrot.slane %v370_v4, 4  ;;  %v378_v19 = vrot.slane %v376_v5, 5  ;;  %v381_v20 = vshrl.u32 %v5064_v0, 16  ;;  %v5112_v60 = vld [vmem:[%s4987_s28 + $0x40] sm:$0xf] }
  0x26   : > { %v3725_v28 = vcombine.low %v345_v8, %v355_v17  ;;  %v364_v29 = vrot.slane %v363_v11, 4  ;;  %v384_v30 = vshll.u32 %v5064_v0, 16  ;;  %v390_v31 = vshll.u32 %v5069_v7, 16 }
  0x27   : > { %v373_v32 = vor.u32 %v372_v18, %v368_v3  ;;  %v383_v33 = vrot.slane %v381_v20, 4  ;;  %v394_v34 = vshrl.u32 %v5069_v7, 16  ;;  %v400_v35 = vshll.u32 %v5077_v16, 16  ;;  %v5124_v18 = vld [vmem:[%s4987_s28 + $0x44] sm:$0x1] }
  0x28   : > { %4378 = vmatprep.mubr.msk.bf16.mxu0 %vm740_vm4, %v3725_v28  ;;  %4243 = vmatmul.mubr.msk.bf16.vlgmr.msra.gmra.mrb[0].mxu1 %vm740_vm4, %v3725_v28  ;;  %v369_v37 = vsel %vm5041_vm5, %v364_v29, %v368_v3  ;;  %v386_v38 = vrot.slane %v384_v30, 5  ;;  %v392_v39 = vrot.slane %v390_v31, 5  ;;  %v405_v43 = vshrl.u32 %v5083_v22, 16  ;;  %v5129_v28 = vld [vmem:[%s4987_s28 + $0x48] sm:$0xf] }
  0x29   : > { %4275 = vmatpush3.bf16.msra.mxu1 %v4990_v9  ;;  %v374_v44 = vrot.slane %v373_v32, 4  ;;  %v396_v47 = vrot.slane %v394_v34, 4  ;;  %v402_v48 = vrot.slane %v400_v35, 5  ;;  %v408_v49 = vshll.u32 %v5083_v22, 16 }
  0x2a   : > { %v387_v50 = vor.u32 %v386_v38, %v383_v33  ;;  %v407_v51 = vrot.slane %v405_v43, 4  ;;  %v414_v54 = vshll.u32 %v5090_v36, 16  ;;  %v418_v55 = vshrl.u32 %v5090_v36, 16  ;;  %4308 = vmatprep.subr.bf16.mxu1 %v5026_v26  ;;  %v5136_v33 = vld [vmem:[%s4987_s28 + $0x4c] sm:$0xf] }
  0x2b   : > { %v379_v57 = vsel %vm5041_vm5, %v374_v44, %v378_v19  ;;  %v397_v58 = vor.u32 %v396_v47, %v392_v39  ;;  %v410_v9 = vrot.slane %v408_v49, 5  ;;  %v424_v59 = vshll.u32 %v5097_v42, 16  ;;  %v5152_v49 = vld [vmem:[%s4987_s28 + $0x50] sm:$0x1] }
  0x2c   : > { %v5114_v61 = vcombine.low %v369_v37, %v379_v57  ;;  %v388_v62 = vrot.slane %v387_v50, 4  ;;  %v416_v63 = vrot.slane %v414_v54, 5  ;;  %v420_v1 = vrot.slane %v418_v55, 4  ;;  %v5157_v54 = vld [vmem:[%s4987_s28 + $0x54] sm:$0xf] }
  0x2d   : > { %v398_v3 = vrot.slane %v397_v58, 4  ;;  %v411_v4 = vor.u32 %v410_v9, %v407_v51  ;;  %v426_v5 = vrot.slane %v424_v59, 5  ;;  %v429_v8 = vshrl.u32 %v5105_v56, 16  ;;  %6435 = vst [vmem:[#allocation6_spill] sm:$0xff] %v5157_v54  ;;  %v5162_v59 = vld [vmem:[%s4987_s28 + $0x58] sm:$0xf] }
  0x2e   : > { %6433 = vst [vmem:[#allocation4_spill] sm:$0xff] %v5114_v61  ;;  %4379 = vmatmul.mubr.msk.bf16.vlgmr.msra.gmra.mrb[0].mxu0 %vm740_vm4, %v5114_v61  ;;  %4246 = vmatprep.mubr.msk.bf16.mxu1 %vm740_vm4, %v5114_v61  ;;  %v393_v11 = vsel %vm5041_vm5, %v388_v62, %v392_v39  ;;  %v421_v17 = vor.u32 %v420_v1, %v416_v63  ;;  %v432_v19 = vshll.u32 %v5105_v56, 16  ;;  %v438_v20 = vshll.u32 %v5112_v60, 16 }
  0x2f   : > { %4411 = vmatpush3.bf16.msra.mxu0 %v4993_v10  ;;  %v403_v29 = vsel %vm5041_vm5, %v398_v3, %v402_v48  ;;  %v412_v30 = vrot.slane %v411_v4, 4  ;;  %v431_v31 = vrot.slane %v429_v8, 4  ;;  %v442_v32 = vshrl.u32 %v5112_v60, 16  ;;  %6437 = vst [vmem:[#allocation8_spill] sm:$0xff] %v5162_v59 }
  0x30   : > { %v5138_v34 = vcombine.low %v393_v11, %v403_v29  ;;  %v422_v35 = vrot.slane %v421_v17, 4  ;;  %v434_v37 = vrot.slane %v432_v19, 5  ;;  %v440_v38 = vrot.slane %v438_v20, 5  ;;  %4444 = vmatprep.subr.bf16.mxu0 %v5023_v25  ;;  %v5175_v29 = vld [vmem:[%s4987_s28 + $0x5c] sm:$0x1] }
  0x31   : > { %v417_v10 = vsel %vm5041_vm5, %v412_v30, %v416_v63  ;;  %v444_v39 = vrot.slane %v442_v32, 4  ;;  %v448_v43 = vshll.u32 %v5124_v18, 16  ;;  %v453_v44 = vshrl.u32 %v5129_v28, 16 }
  0x32   : > { %6434 = vst [vmem:[#allocation5_spill] sm:$0xff] %v5138_v34  ;;  %4382 = vmatprep.mubr.msk.bf16.mxu0 %vm740_vm4, %v5138_v34  ;;  %4247 = vmatmul.mubr.msk.bf16.gmra.mrb[4].mxu1 %vm740_vm4, %v5138_v34  ;;  %v427_v47 = vsel %vm5041_vm5, %v422_v35, %v426_v5  ;;  %v435_v48 = vor.u32 %v434_v37, %v431_v31  ;;  %v456_v50 = vshll.u32 %v5129_v28, 16  ;;  %v462_v51 = vshll.u32 %v5136_v33, 16  ;;  %v5179_v31 = vld [vmem:[%s4987_s28 + $0x60] sm:$0xf] }
  0x33   : > { %v5159_v55 = vcombine.low %v417_v10, %v427_v47  ;;  %v445_v57 = vor.u32 %v444_v39, %v440_v38  ;;  %v450_v58 = vrot.slane %v448_v43, 5  ;;  %v455_v9 = vrot.slane %v453_v44, 4  ;;  %v5184_v39 = vld [vmem:[%s4987_s28 + $0x64] sm:$0xf]  ;;  %v5367_v34 = vld [vmem:[%s4987_s28 + $0xa0] sm:$0xf] }
  0x34   : > { %v436_v62 = vrot.slane %v435_v48, 4  ;;  %v458_v63 = vrot.slane %v456_v50, 5  ;;  %v464_v1 = vrot.slane %v462_v51, 5  ;;  %v466_v3 = vshrl.u32 %v5136_v33, 16 }
  0x35   : > { %6436 = vst [vmem:[#allocation7_spill] sm:$0xff] %v5159_v55  ;;  %4250 = vmatprep.mubr.msk.bf16.mxu1 %vm740_vm4, %v5159_v55  ;;  %v446_v4 = vrot.slane %v445_v57, 4  ;;  %v472_v5 = vshll.u32 %v5152_v49, 16  ;;  %v477_v8 = vshrl.u32 %v5157_v54, 16  ;;  %v480_v11 = vshll.u32 %v5157_v54, 16 }
  0x36   : > { %4383 = vmatmul.mubr.msk.bf16.gmra.mrb[4].mxu0 %vm740_vm4, %v5159_v55  ;;  %v441_v17 = vsel %vm5041_vm5, %v436_v62, %v440_v38  ;;  %v459_v19 = vor.u32 %v458_v63, %v455_v9  ;;  %v468_v20 = vrot.slane %v466_v3, 4  ;;  %v486_v30 = vshll.u32 %v5162_v59, 16  ;;  %v5198_v62 = vld [vmem:[%s4987_s28 + $0x68] sm:$0x1] }
  0x37   : > { %v451_v32 = vsel %vm5041_vm5, %v446_v4, %v450_v58  ;;  %v474_v35 = vrot.slane %v472_v5, 5  ;;  %v479_v37 = vrot.slane %v477_v8, 4  ;;  %v482_v10 = vrot.slane %v480_v11, 5 }
  0x38   : > { %v5186_v43 = vcombine.low %v441_v17, %v451_v32  ;;  %v460_v38 = vrot.slane %v459_v19, 4  ;;  %v469_v44 = vor.u32 %v468_v20, %v464_v1  ;;  %v488_v47 = vrot.slane %v486_v30, 5 }
  0x39   : > { %v483_v48 = vor.u32 %v482_v10, %v479_v37  ;;  %v490_v50 = vshrl.u32 %v5162_v59, 16  ;;  %v496_v51 = vshll.u32 %v5175_v29, 16  ;;  %v501_v57 = vshrl.u32 %v5179_v31, 16 }
  0x3a   : > { %6438 = vst [vmem:[#allocation9_spill] sm:$0xff] %v5186_v43  ;;  %4386 = vmatprep.mubr.msk.bf16.mxu0 %vm740_vm4, %v5186_v43  ;;  %4251 = vmatmul.mubr.msk.bf16.gmra.mrb[8].mxu1 %vm740_vm4, %v5186_v43  ;;  %v465_v58 = vsel %vm5041_vm5, %v460_v38, %v464_v1  ;;  %v470_v9 = vrot.slane %v469_v44, 4  ;;  %v504_v63 = vshll.u32 %v5179_v31, 16  ;;  %v510_v3 = vshll.u32 %v5184_v39, 16  ;;  %v5206_v1 = vld [vmem:[%s4987_s28 + $0x6c] sm:$0xf] }
  0x3b   : > { %v484_v4 = vrot.slane %v483_v48, 4  ;;  %v492_v5 = vrot.slane %v490_v50, 4  ;;  %v498_v8 = vrot.slane %v496_v51, 5  ;;  %v503_v11 = vrot.slane %v501_v57, 4  ;;  %v5222_v57 = vld [vmem:[%s4987_s28 + $0x70] sm:$0xf] }
  0x3c   : > { %v475_v17 = vsel %vm5041_vm5, %v470_v9, %v474_v35  ;;  %v506_v19 = vrot.slane %v504_v63, 5  ;;  %v512_v20 = vrot.slane %v510_v3, 5  ;;  %v514_v30 = vshrl.u32 %v5184_v39, 16 }
  0x3d   : > { %v5208_v32 = vcombine.low %v465_v58, %v475_v17  ;;  %v489_v37 = vsel %vm5041_vm5, %v484_v4, %v488_v47  ;;  %v493_v10 = vor.u32 %v492_v5, %v488_v47  ;;  %v520_v38 = vshll.u32 %v5198_v62, 16 }
  0x3e   : > { %v507_v35 = vor.u32 %v506_v19, %v503_v11  ;;  %v516_v48 = vrot.slane %v514_v30, 4  ;;  %v3789_v50 = vrot.slane %v5012_v21, 9  ;;  %v1277_v51 = vrot.slane %v5016_v23, 5  ;;  %v5235_v11 = vld [vmem:[%s4987_s28 + $0x74] sm:$0x1] }
  0x3f   : > { %6439 = vst [vmem:[#allocation10_spill] sm:$0xff] %v5208_v32  ;;  %4387 = vmatmul.mubr.msk.bf16.gmra.mrb[8].mxu0 %vm740_vm4, %v5208_v32  ;;  %4254 = vmatprep.mubr.msk.bf16.mxu1 %vm740_vm4, %v5208_v32  ;;  %v494_v47 = vrot.slane %v493_v10, 4  ;;  %v522_v58 = vrot.slane %v520_v38, 5  ;;  %v525_v9 = vshrl.u32 %v5206_v1, 16  ;;  %v528_v63 = vshll.u32 %v5206_v1, 16 }
  0x40   : > { %v508_v3 = vrot.slane %v507_v35, 4  ;;  %v517_v4 = vor.u32 %v516_v48, %v512_v20  ;;  %v1278_v21 = vsel %vm5215_vm8, %v3789_v50, %v1277_v51  ;;  %v1279_v23 = vrot.slane %v1277_v51, 4 }
  0x41   : > { %v499_v5 = vsel %vm5041_vm5, %v494_v47, %v498_v8  ;;  %v527_v17 = vrot.slane %v525_v9, 4  ;;  %v530_v19 = vrot.slane %v528_v63, 5  ;;  %v534_v30 = vshll.u32 %v5222_v57, 16  ;;  %v5247_v8 = vld [vmem:[%s4987_s28 + $0x78] sm:$0xf] }
  0x42   : > { %v5238_v10 = vcombine.low %v489_v37, %v499_v5  ;;  %v513_v38 = vsel %vm5041_vm5, %v508_v3, %v512_v20  ;;  %v518_v35 = vrot.slane %v517_v4, 4  ;;  %v1281_v48 = vsel %vm5215_vm8, %v1279_v23, %v1280_v52  ;;  %v5263_v63 = vld [vmem:[%s4987_s28 + $0x7c] sm:$0xf]  ;;  %v5268_v23 = vld [vmem:[%s4987_s28 + $0x80] sm:$0x1] }
  0x43   : > { %v5249_v50 = vcombine.low %v1278_v21, %v1281_v48  ;;  %v531_v51 = vor.u32 %v530_v19, %v527_v17  ;;  %v536_v47 = vrot.slane %v534_v30, 5  ;;  %v538_v9 = vshrl.u32 %v5222_v57, 16 }
  0x44   : > { %6442 = vst [vmem:[#allocation11_spill] sm:$0xff] %v5238_v10  ;;  %4390 = vmatprep.mubr.msk.bf16.mxu0 %vm740_vm4, %v5238_v10  ;;  %4255 = vmatmul.mubr.msk.bf16.gmra.mrb[12].mxu1 %vm740_vm4, %v5238_v10  ;;  %v523_v24 = vsel %vm5041_vm5, %v518_v35, %v522_v58  ;;  %v544_v52 = vshll.u32 %v5235_v11, 16  ;;  %v3790_v20 = vrot.slane %v5037_v40, 9  ;;  %v1286_v37 = vrot.slane %v1284_v12, 4 }
  0x45   : > { %6443 = vst [vmem:[#allocation12_spill] sm:$0xff] %v5249_v50  ;;  %v5265_v3 = vcombine.low %v513_v38, %v523_v24  ;;  %v532_v4 = vrot.slane %v531_v51, 4  ;;  %v540_v21 = vrot.slane %v538_v9, 4  ;;  %v549_v5 = vshrl.u32 %v5247_v8, 16  ;;  %v5294_v24 = vld [vmem:[%s4987_s28 + $0x84] sm:$0xf] }
  0x46   : > { %v546_v17 = vrot.slane %v544_v52, 5  ;;  %v1285_v58 = vsel %vm5215_vm8, %v3790_v20, %v1284_v12  ;;  %v1288_v19 = vsel %vm5215_vm8, %v1286_v37, %v1287_v13  ;;  %v552_v30 = vshll.u32 %v5247_v8, 16 }
  0x47   : > { %6444 = vst [vmem:[#allocation13_spill] sm:$0xff] %v5265_v3  ;;  %4391 = vmatmul.mubr.msk.bf16.gmra.mrb[12].mxu0 %vm740_vm4, %v5265_v3  ;;  %4258 = vmatprep.mubr.msk.bf16.mxu1 %vm740_vm4, %v5265_v3  ;;  %v537_v38 = vsel %vm5041_vm5, %v532_v4, %v536_v47  ;;  %v541_v35 = vor.u32 %v540_v21, %v536_v47  ;;  %v551_v12 = vrot.slane %v549_v5, 4  ;;  %v558_v13 = vshll.u32 %v5263_v63, 16 }
  0x48   : > { %v5286_v48 = vcombine.low %v1285_v58, %v1288_v19  ;;  %4412 = vmatprep.mubr.msk.bf16.mxu0 %vm740_vm4, %v5249_v50  ;;  %v554_v53 = vrot.slane %v552_v30, 5  ;;  %v562_v51 = vshrl.u32 %v5263_v63, 16  ;;  %v568_v9 = vshll.u32 %v5268_v23, 16  ;;  %v5300_v19 = vld [vmem:[%s4987_s28 + $0x88] sm:$0xf] }
  0x49   : > { %v542_v52 = vrot.slane %v541_v35, 4  ;;  %v3791_v47 = vrot.slane %v5064_v0, 9  ;;  %v1291_v20 = vrot.slane %v5069_v7, 5  ;;  %v1294_v37 = vrot.slane %v5077_v16, 5 }
  0x4a   : > { %6445 = vst [vmem:[#allocation14_spill] sm:$0xff] %v5286_v48  ;;  %v555_v4 = vor.u32 %v554_v53, %v551_v12  ;;  %v560_v21 = vrot.slane %v558_v13, 5  ;;  %v564_v5 = vrot.slane %v562_v51, 4  ;;  %v570_v58 = vrot.slane %v568_v9, 5  ;;  %v5310_v12 = vld [vmem:[%s4987_s28 + $0x8c] sm:$0x1] }
  0x4b   : > { %v547_v30 = vsel %vm5041_vm5, %v542_v52, %v546_v17  ;;  %v1292_v3 = vsel %vm5215_vm8, %v3791_v47, %v1291_v20  ;;  %v1293_v35 = vrot.slane %v1291_v20, 4  ;;  %v573_v10 = vshrl.u32 %v5294_v24, 16 }
  0x4c   : > { %v5307_v32 = vcombine.low %v537_v38, %v547_v30  ;;  %v556_v43 = vrot.slane %v555_v4, 4  ;;  %v565_v16 = vor.u32 %v564_v5, %v560_v21  ;;  %v576_v53 = vshll.u32 %v5294_v24, 16  ;;  %v5324_v4 = vld [vmem:[%s4987_s28 + $0x90] sm:$0xf] }
  0x4d   : > { %v1295_v13 = vsel %vm5215_vm8, %v1293_v35, %v1294_v37  ;;  %v575_v51 = vrot.slane %v573_v10, 4  ;;  %v582_v17 = vshll.u32 %v5300_v19, 16  ;;  %v586_v9 = vshrl.u32 %v5300_v19, 16 }
  0x4e   : > { %6446 = vst [vmem:[#allocation15_spill] sm:$0xff] %v5307_v32  ;;  %4259 = vmatmul.mubr.msk.bf16.gmra.mrb[16].mxu1 %vm740_vm4, %v5307_v32  ;;  %v561_v38 = vsel %vm5041_vm5, %v556_v43, %v560_v21  ;;  %v566_v52 = vrot.slane %v565_v16, 4  ;;  %v5321_v47 = vcombine.low %v1292_v3, %v1295_v13  ;;  %v578_v20 = vrot.slane %v576_v53, 5  ;;  %v5338_v16 = vld [vmem:[%s4987_s28 + $0x94] sm:$0xf] }
  0x4f   : > { %4413 = vmatmul.mubr.msk.bf16.vlgmr.msra.gmra.mrb[0].mxu0 %vm740_vm4, %v5286_v48  ;;  %v584_v10 = vrot.slane %v582_v17, 5  ;;  %v588_v37 = vrot.slane %v586_v9, 4  ;;  %v592_v5 = vshll.u32 %v5310_v12, 16  ;;  %v3792_v30 = vrot.slane %v5083_v22, 9  ;;  %v5343_v9 = vld [vmem:[%s4987_s28 + $0x98] sm:$0x1] }
  0x50   : > { %6447 = vst [vmem:[#allocation16_spill] sm:$0xff] %v5321_v47  ;;  %4445 = vmatpush3.bf16.msra.mxu0 %v5023_v25  ;;  %v571_v43 = vsel %vm5041_vm5, %v566_v52, %v570_v58  ;;  %4416 = vmatprep.mubr.msk.bf16.mxu0 %vm740_vm4, %v5321_v47  ;;  %v579_v3 = vor.u32 %v578_v20, %v575_v51  ;;  %v1298_v21 = vrot.slane %v5090_v36, 5  ;;  %v1301_v35 = vrot.slane %v5097_v42, 5  ;;  %v5360_v32 = vld [vmem:[%s4987_s28 + $0x9c] sm:$0xf] }
  0x51   : > { %v5340_v53 = vcombine.low %v561_v38, %v571_v43  ;;  %v589_v13 = vor.u32 %v588_v37, %v584_v10  ;;  %v594_v17 = vrot.slane %v592_v5, 5  ;;  %v597_v25 = vshrl.u32 %v5324_v4, 16  ;;  %4478 = vmatprep.subr.bf16.mxu0 %v5029_v27 }
  0x52   : > { %v580_v58 = vrot.slane %v579_v3, 4  ;;  %v1299_v51 = vsel %vm5215_vm8, %v3792_v30, %v1298_v21  ;;  %v1300_v52 = vrot.slane %v1298_v21, 4  ;;  %v600_v42 = vshll.u32 %v5324_v4, 16 }
  0x53   : > { %6448 = vst [vmem:[#allocation17_spill] sm:$0xff] %v5340_v53  ;;  %4262 = vmatprep.mubr.msk.bf16.mxu1 %vm740_vm4, %v5340_v53  ;;  %v590_v38 = vrot.slane %v589_v13, 4  ;;  %v599_v20 = vrot.slane %v597_v25, 4  ;;  %v606_v37 = vshll.u32 %v5338_v16, 16  ;;  %v610_v5 = vshrl.u32 %v5338_v16, 16 }
  0x54   : > { %v585_v43 = vsel %vm5041_vm5, %v580_v58, %v584_v10  ;;  %v1302_v3 = vsel %vm5215_vm8, %v1300_v52, %v1301_v35  ;;  %v602_v30 = vrot.slane %v600_v42, 5  ;;  %v616_v21 = vshll.u32 %v5343_v9, 16 }
  0x55   : > { %v595_v53 = vsel %vm5041_vm5, %v590_v38, %v594_v17  ;;  %v5364_v13 = vcombine.low %v1299_v51, %v1302_v3  ;;  %v608_v25 = vrot.slane %v606_v37, 5  ;;  %v612_v55 = vrot.slane %v610_v5, 4  ;;  %v5380_v38 = vld [vmem:[%s4987_s28 + $0xa4] sm:$0x1] }
  0x56   : > { %v5369_v61 = vcombine.low %v585_v43, %v595_v53  ;;  %v603_v10 = vor.u32 %v602_v30, %v599_v20  ;;  %v618_v58 = vrot.slane %v616_v21, 5  ;;  %v3793_v35 = vrot.slane %v5105_v56, 9 }
  0x57   : > { %6449 = vst [vmem:[#allocation18_spill] sm:$0xff] %v5364_v13  ;;  %4417 = vmatmul.mubr.msk.bf16.gmra.mrb[4].mxu0 %vm740_vm4, %v5364_v13  ;;  %v613_v52 = vor.u32 %v612_v55, %v608_v25  ;;  %v1305_v42 = vrot.slane %v5112_v60, 5  ;;  %v1308_v17 = vrot.slane %v5124_v18, 5  ;;  %v621_v51 = vshrl.u32 %v5360_v32, 16  ;;  %v5390_v13 = vld [vmem:[%s4987_s28 + $0xa8] sm:$0xf] }
  0x58   : > { %6450 = vst [vmem:[#allocation19_spill] sm:$0xff] %v5369_v61  ;;  %4263 = vmatmul.mubr.msk.bf16.gmra.mrb[20].mxu1 %vm740_vm4, %v5369_v61  ;;  %v604_v53 = vrot.slane %v603_v10, 4  ;;  %v624_v20 = vshll.u32 %v5360_v32, 16  ;;  %v630_v37 = vshll.u32 %v5367_v34, 16  ;;  %v634_v55 = vshrl.u32 %v5367_v34, 16 }
  0x59   : > { %v614_v5 = vrot.slane %v613_v52, 4  ;;  %v1306_v18 = vsel %vm5215_vm8, %v3793_v35, %v1305_v42  ;;  %v1307_v43 = vrot.slane %v1305_v42, 4  ;;  %v623_v3 = vrot.slane %v621_v51, 4  ;;  %v5399_v42 = vld [vmem:[%s4987_s28 + $0xac] sm:$0xf] }
  0x5a   : > { %v609_v30 = vsel %vm5041_vm5, %v604_v53, %v608_v25  ;;  %v626_v21 = vrot.slane %v624_v20, 5  ;;  %v632_v10 = vrot.slane %v630_v37, 5  ;;  %v636_v61 = vrot.slane %v634_v55, 4 }
  0x5b   : > { %v619_v47 = vsel %vm5041_vm5, %v614_v5, %v618_v58  ;;  %v1309_v6 = vsel %vm5215_vm8, %v1307_v43, %v1308_v17  ;;  %v640_v52 = vshll.u32 %v5380_v38, 16  ;;  %v3794_v35 = vrot.slane %v5129_v28, 9 }
  0x5c   : > { %v5401_v51 = vcombine.low %v609_v30, %v619_v47  ;;  %v5403_v25 = vcombine.low %v1306_v18, %v1309_v6  ;;  %v627_v53 = vor.u32 %v626_v21, %v623_v3  ;;  %v637_v20 = vor.u32 %v636_v61, %v632_v10  ;;  %v5413_v6 = vld [vmem:[%s4987_s28 + $0xb0] sm:$0x1] }
  0x5d   : > { %v642_v37 = vrot.slane %v640_v52, 5  ;;  %v1312_v55 = vrot.slane %v5136_v33, 5  ;;  %v1315_v58 = vrot.slane %v5152_v49, 5  ;;  %v645_v17 = vshrl.u32 %v5390_v13, 16 }
  0x5e   : > { %6451 = vst [vmem:[#allocation20_spill] sm:$0xff] %v5401_v51  ;;  %6452 = vst [vmem:[#allocation21_spill] sm:$0xff] %v5403_v25  ;;  %4266 = vmatprep.mubr.msk.bf16.mxu1 %vm740_vm4, %v5401_v51  ;;  %4420 = vmatprep.mubr.msk.bf16.mxu0 %vm740_vm4, %v5403_v25  ;;  %v628_v47 = vrot.slane %v627_v53, 4  ;;  %v638_v5 = vrot.slane %v637_v20, 4  ;;  %v648_v61 = vshll.u32 %v5390_v13, 16  ;;  %v654_v18 = vshll.u32 %v5399_v42, 16 }
  0x5f   : > { %v1313_v49 = vsel %vm5215_vm8, %v3794_v35, %v1312_v55  ;;  %v1314_v43 = vrot.slane %v1312_v55, 4  ;;  %v647_v3 = vrot.slane %v645_v17, 4  ;;  %v658_v30 = vshrl.u32 %v5399_v42, 16  ;;  %v5425_v51 = vld [vmem:[%s4987_s28 + $0xb4] sm:$0xf] }
  0x60   : > { %v633_v21 = vsel %vm5041_vm5, %v628_v47, %v632_v10  ;;  %v643_v52 = vsel %vm5041_vm5, %v638_v5, %v642_v37  ;;  %v650_v53 = vrot.slane %v648_v61, 5  ;;  %v656_v20 = vrot.slane %v654_v18, 5  ;;  %v5437_v47 = vld [vmem:[%s4987_s28 + $0xb8] sm:$0xf] }
  0x61   : > { %v5427_v25 = vcombine.low %v633_v21, %v643_v52  ;;  %v1316_v35 = vsel %vm5215_vm8, %v1314_v43, %v1315_v58  ;;  %v660_v55 = vrot.slane %v658_v30, 4  ;;  %v664_v17 = vshll.u32 %v5413_v6, 16  ;;  %v5443_v58 = vld [vmem:[%s4987_s28 + $0xbc] sm:$0x1] }
  0x62   : > { %v5432_v48 = vcombine.low %v1313_v49, %v1316_v35  ;;  %v651_v50 = vor.u32 %v650_v53, %v647_v3  ;;  %v3795_v10 = vrot.slane %v5157_v54, 9  ;;  %v1319_v37 = vrot.slane %v5162_v59, 5 }
  0x63   : > { %6453 = vst [vmem:[#allocation22_spill] sm:$0xff] %v5427_v25  ;;  %4267 = vmatmul.mubr.msk.bf16.gmra.mrb[24].mxu1 %vm740_vm4, %v5427_v25  ;;  %v661_v5 = vor.u32 %v660_v55, %v656_v20  ;;  %v666_v61 = vrot.slane %v664_v17, 5  ;;  %v1322_v18 = vrot.slane %v5175_v29, 5  ;;  %v669_v43 = vshrl.u32 %v5425_v51, 16 }
  0x64   : > { %6454 = vst [vmem:[#allocation23_spill] sm:$0xff] %v5432_v48  ;;  %4421 = vmatmul.mubr.msk.bf16.gmra.mrb[8].mxu0 %vm740_vm4, %v5432_v48  ;;  %v652_v49 = vrot.slane %v651_v50, 4  ;;  %v1320_v3 = vsel %vm5215_vm8, %v3795_v10, %v1319_v37  ;;  %v1321_v30 = vrot.slane %v1319_v37, 4  ;;  %v672_v21 = vshll.u32 %v5425_v51, 16 }
  0x65   : > { %v662_v52 = vrot.slane %v661_v5, 4  ;;  %v671_v53 = vrot.slane %v669_v43, 4  ;;  %v678_v35 = vshll.u32 %v5437_v47, 16  ;;  %v682_v29 = vshrl.u32 %v5437_v47, 16 }
  0x66   : > { %v657_v55 = vsel %vm5041_vm5, %v652_v49, %v656_v20  ;;  %v1323_v17 = vsel %vm5215_vm8, %v1321_v30, %v1322_v18  ;;  %v674_v25 = vrot.slane %v672_v21, 5  ;;  %v688_v50 = vshll.u32 %v5443_v58, 16 }
  0x67   : > { %v667_v10 = vsel %vm5041_vm5, %v662_v52, %v666_v61  ;;  %v5460_v37 = vcombine.low %v1320_v3, %v1323_v17  ;;  %v680_v5 = vrot.slane %v678_v35, 5  ;;  %v684_v43 = vrot.slane %v682_v29, 4 }
  0x68   : > { %v5462_v48 = vcombine.low %v657_v55, %v667_v10  ;;  %v675_v27 = vor.u32 %v674_v25, %v671_v53  ;;  %v690_v54 = vrot.slane %v688_v50, 5  ;;  %v3796_v59 = vrot.slane %v5179_v31, 9 }
  0x69   : > { %4424 = vmatprep.mubr.msk.bf16.mxu0 %vm740_vm4, %v5460_v37  ;;  %v685_v20 = vor.u32 %v684_v43, %v680_v5  ;;  %v1326_v18 = vrot.slane %v5184_v39, 5  ;;  %v1329_v49 = vrot.slane %v5198_v62, 5  ;;  %v3797_v61 = vrot.slane %v5206_v1, 9 }
  0x6a   : > { %4270 = vmatprep.mubr.msk.bf16.mxu1 %vm740_vm4, %v5462_v48  ;;  %v676_v3 = vrot.slane %v675_v27, 4  ;;  %v3756_v25 = vcombine.low %v5000_v14, %v5003_v15  ;;  %v1333_v30 = vrot.slane %v5222_v57, 5  ;;  %v1336_v21 = vrot.slane %v5235_v11, 5 }
  0x6b   : > { %v686_v52 = vrot.slane %v685_v20, 4  ;;  %v1327_v53 = vsel %vm5215_vm8, %v3796_v59, %v1326_v18  ;;  %v1328_v35 = vrot.slane %v1326_v18, 4  ;;  %v1340_v62 = vrot.slane %v5263_v63, 5 }
  0x6c   : > { %v681_v29 = vsel %vm5041_vm5, %v676_v3, %v680_v5  ;;  %v1334_v27 = vsel %vm5215_vm8, %v3797_v61, %v1333_v30  ;;  %v1335_v55 = vrot.slane %v1333_v30, 4  ;;  %v3798_v14 = vrot.slane %v5247_v8, 9 }
  0x6d   : > { %v691_v15 = vsel %vm5041_vm5, %v686_v52, %v690_v54  ;;  %v1330_v11 = vsel %vm5215_vm8, %v1328_v35, %v1329_v49  ;;  %v1342_v17 = vrot.slane %v1340_v62, 4  ;;  %v1343_v59 = vrot.slane %v5268_v23, 5 }
  0x6e   : > { %v5489_v50 = vcombine.low %v681_v29, %v691_v15  ;;  %v5491_v10 = vcombine.low %v1327_v53, %v1330_v11  ;;  %v1337_v5 = vsel %vm5215_vm8, %v1335_v55, %v1336_v21  ;;  %v3799_v20 = vrot.slane %v5294_v24, 9 }
  0x6f   : > { %v5495_v43 = vcombine.low %v1334_v27, %v1337_v5  ;;  %v1347_v18 = vrot.slane %v5300_v19, 5  ;;  %v1350_v54 = vrot.slane %v5310_v12, 5  ;;  %v1341_v23 = vsel %vm5215_vm8, %v3798_v14, %v1340_v62  ;;  %v299_v5 = vld [vmem:[%s4971_s24 + $0x6] sm:$0x3] }
  0x70   : > { %4271 = vmatmul.mubr.msk.bf16.gmra.mrb[28].mxu1 %vm740_vm4, %v5489_v50  ;;  %4425 = vmatmul.mubr.msk.bf16.gmra.mrb[12].mxu0 %vm740_vm4, %v5491_v10  ;;  %v1344_v49 = vsel %vm5215_vm8, %v1342_v17, %v1343_v59  ;;  %v1354_v3 = vrot.slane %v5338_v16, 5  ;;  %v1361_v30 = vrot.slane %v5367_v34, 5  ;;  %v3800_v52 = vrot.slane %v5324_v4, 9 }
  0x71   : > { %4276 = vmatprep.mubr.msk.bf16.mxu1 %vm740_vm4, %v3756_v25  ;;  %4428 = vmatprep.mubr.msk.bf16.mxu0 %vm740_vm4, %v5495_v43  ;;  %v1349_v61 = vrot.slane %v1347_v18, 4  ;;  %v1348_v21 = vsel %vm5215_vm8, %v3799_v20, %v1347_v18  ;;  %v5517_v25 = vcombine.low %v1341_v23, %v1344_v49  ;;  %v1357_v35 = vrot.slane %v5343_v9, 5 }
  0x72   : > { %v1356_v53 = vrot.slane %v1354_v3, 4  ;;  %v5523_v62 = vcombine.low %v5037_v40, %v5050_v46  ;;  %v3801_v29 = vrot.slane %v5360_v32, 9  ;;  %v1363_v55 = vrot.slane %v1361_v30, 4 }
  0x73   : > { %v1351_v12 = vsel %vm5215_vm8, %v1349_v61, %v1350_v54  ;;  %v1364_v14 = vrot.slane %v5380_v38, 5  ;;  %v1368_v15 = vrot.slane %v5399_v42, 5  ;;  %v1355_v40 = vsel %vm5215_vm8, %v3800_v52, %v1354_v3 }
  0x74   : > { %v5526_v27 = vcombine.low %v1348_v21, %v1351_v12  ;;  %v1358_v46 = vsel %vm5215_vm8, %v1356_v53, %v1357_v35  ;;  %v5543_v9 = vcombine.low %v5064_v0, %v5069_v7  ;;  %v1362_v38 = vsel %vm5215_vm8, %v3801_v29, %v1361_v30 }
  0x75   : > { %v3802_v11 = vrot.slane %v5390_v13, 9  ;;  %v5550_v17 = vcombine.low %v5179_v31, %v5184_v39  ;;  %v1375_v59 = vrot.slane %v5437_v47, 5  ;;  %v5559_v0 = vcombine.low %v5206_v1, %v5222_v57 }
  0x76   : > { %v5563_v7 = vcombine.low %v5247_v8, %v5263_v63  ;;  %v5566_v31 = vcombine.low %v1355_v40, %v1358_v46  ;;  %v1370_v39 = vrot.slane %v1368_v15, 4  ;;  %v1371_v20 = vrot.slane %v5413_v6, 5  ;;  %v5622_v6 = vld [vmem:[%s4987_s28 + $0xc0] sm:$0xf] }
  0x77   : > { %v5571_v18 = vcombine.low %v5294_v24, %v5300_v19  ;;  %v5575_v54 = vcombine.low %v5324_v4, %v5338_v16  ;;  %v5579_v1 = vcombine.low %v5360_v32, %v5367_v34  ;;  %v5583_v57 = vcombine.low %v5390_v13, %v5399_v42  ;;  %v5601_v16 = vld [vmem:[%s4987_s28 + $0xc4] sm:$0xf] }
  0x78   : > { %4277 = vmatmul.mubr.msk.bf16.vlgmr.msra.gmra.mrb[0].mxu1 %vm740_vm4, %v5047_v45  ;;  %4429 = vmatmul.mubr.msk.bf16.gmra.mrb[16].mxu0 %vm740_vm4, %v5517_v25  ;;  %v5587_v8 = vcombine.low %v5425_v51, %v5437_v47  ;;  %v5591_v63 = vcombine.low %v5083_v22, %v5090_v36  ;;  %v5596_v19 = vand.u32 %v4964_v2, %v299_v5  ;;  %v3803_v34 = vrot.slane %v5425_v51, 9  ;;  %v292_v47 = vld [vmem:[%s4987_s28 + $0xc8] sm:$0x1] }
  0x79   : > { %4309 = vmatpush3.bf16.msra.mxu1 %v5026_v26  ;;  %4280 = vmatprep.mubr.msk.bf16.mxu1 %vm740_vm4, %v5523_v62  ;;  %v1365_v26 = vsel %vm5215_vm8, %v1363_v55, %v1364_v14  ;;  %v1377_v32 = vrot.slane %v1375_v59, 4  ;;  %v1378_v4 = vrot.slane %v5443_v58, 5  ;;  %v1369_v22 = vsel %vm5215_vm8, %v3802_v11, %v1368_v15 }
  0x7a   : > { %4432 = vmatprep.mubr.msk.bf16.mxu0 %vm740_vm4, %v5526_v27  ;;  %v5593_v24 = vcombine.low %v1362_v38, %v1365_v26  ;;  %4342 = vmatprep.subr.bf16.mxu1 %v5596_v19  ;;  %v1372_v36 = vsel %vm5215_vm8, %v1370_v39, %v1371_v20  ;;  %v2105_v13 = vrot.slane %v5601_v16, 5  ;;  %v1376_v42 = vsel %vm5215_vm8, %v3803_v34, %v1375_v59  ;;  %v6455_v26 = vld [vmem:[#allocation8_spill] sm:$0xff]  ;;  %v6456_v59 = vld [vmem:[#allocation6_spill] sm:$0xff] }
  0x7b   : > { %v1379_v51 = vsel %vm5215_vm8, %v1377_v32, %v1378_v4  ;;  %v5627_v58 = vcombine.low %v5105_v56, %v5112_v60  ;;  %v5629_v23 = vcombine.low %v1369_v22, %v1372_v36  ;;  %v5633_v49 = vcombine.low %v5129_v28, %v5136_v33  ;;  %v304_v4 = vld [vmem:[%s4971_s24 + $0x10] sm:$0x3]  ;;  %v6457_v36 = vld [vmem:[#allocation3_spill] sm:$0xff] }
  0x7c   : > { %v1877_v61 = vshrl.u32 %v5622_v6, 16  ;;  %v1880_v3 = vshll.u32 %v5622_v6, 16  ;;  %v1886_v30 = vshll.u32 %v5601_v16, 16  ;;  %v1890_v21 = vshrl.u32 %v5601_v16, 16 }
  0x7d   : > { %v5639_v12 = vcombine.low %v1376_v42, %v1379_v51  ;;  %v3870_v52 = vrot.slane %v5622_v6, 9  ;;  %v2107_v56 = vrot.slane %v2105_v13, 4  ;;  %v2108_v60 = vrot.slane %v292_v47, 5  ;;  %v4867_v42 = vld [vmem:[%s4987_s28 + $0x8] sm:$0x1] }
  0x7e   : > { %v1879_v53 = vrot.slane %v1877_v61, 4  ;;  %v1882_v35 = vrot.slane %v1880_v3, 5  ;;  %v1888_v29 = vrot.slane %v1886_v30, 5  ;;  %v1892_v55 = vrot.slane %v1890_v21, 4 }
  0x7f   : > { %v1896_v14 = vshll.u32 %v292_v47, 16  ;;  %v2106_v15 = vsel %vm5215_vm8, %v3870_v52, %v2105_v13  ;;  %v2109_v40 = vsel %vm5215_vm8, %v2107_v56, %v2108_v60  ;;  %v5656_v5 = vcombine.low %v6456_v59, %v6455_v26  ;;  %v4868_v47 = vld [vmem:[%s4987_s28] sm:$0xf]  ;;  %v6458_v56 = vld [vmem:[#allocation12_spill] sm:$0xff]  ;;  %v6471_v26 = vld [vmem:[#allocation13_spill] sm:$0xff] }
  0x80   : > { %4281 = vmatmul.mubr.msk.bf16.gmra.mrb[4].mxu1 %vm740_vm4, %v5543_v9  ;;  %4433 = vmatmul.mubr.msk.bf16.gmra.mrb[20].mxu0 %vm740_vm4, %v5566_v31  ;;  %v1883_v28 = vor.u32 %v1882_v35, %v1879_v53  ;;  %v1893_v33 = vor.u32 %v1892_v55, %v1888_v29  ;;  %v5658_v39 = vcombine.low %v2106_v15, %v2109_v40  ;;  %v1273_v51 = vrot.slane %v4867_v42, 5  ;;  %v6459_v60 = vld [vmem:[#allocation14_spill] sm:$0xff]  ;;  %v6461_v35 = vld [vmem:[#allocation16_spill] sm:$0xff]  ;;  %v6463_v55 = vld [vmem:[#allocation21_spill] sm:$0xff] }
  0x81   : > { %4284 = vmatprep.mubr.msk.bf16.mxu1 %vm740_vm4, %v5591_v63  ;;  %4436 = vmatprep.mubr.msk.bf16.mxu0 %vm740_vm4, %v5593_v24  ;;  %v1898_v11 = vrot.slane %v1896_v14, 5  ;;  %v2757_v22 = vand.u32 %v4964_v2, %v304_v4  ;;  %v4866_v2 = vld [vmem:[%s4987_s28 + $0x4] sm:$0xf]  ;;  %v3788_v61 = vrot.slane %v4868_v47, 9  ;;  %v5749_v14 = vld [vmem:[%s4987_s28 + $0xd0] sm:$0xf] }
  0x82   : > { %v1884_v46 = vrot.slane %v1883_v28, 4  ;;  %v1894_v38 = vrot.slane %v1893_v33, 4  ;;  %v1270_v13 = vrot.slane %v4866_v2, 5  ;;  %v6460_v53 = vld [vmem:[#allocation2_spill] sm:$0xff]  ;;  %v6464_v28 = vld [vmem:[#allocation23_spill] sm:$0xff]  ;;  %v6466_v15 = vld [vmem:[#allocation5_spill] sm:$0xff] }
  0x83   : > { %v5746_v33 = vld [vmem:[%s4987_s28 + $0xcc] sm:$0xf]  ;;  %v6475_v2 = vld [vmem:[#allocation20_spill] sm:$0xff]  ;;  %v2745_v41 = vrot.slane %v5749_v14, 5  ;;  %v4910_v44 = vmov 0  }
  0x84   : > { %v1889_v20 = vsel %vm5041_vm5, %v1884_v46, %v1888_v29  ;;  %v1899_v34 = vsel %vm5041_vm5, %v1894_v38, %v1898_v11  ;;  %v1272_v3 = vrot.slane %v1270_v13, 4  ;;  %v1271_v30 = vsel %vm5215_vm8, %v3788_v61, %v1270_v13  ;;  %v6462_v29 = vld [vmem:[#allocation18_spill] sm:$0xff]  ;;  %v6467_v40 = vld [vmem:[#allocation7_spill] sm:$0xff]  ;;  %v6468_v46 = vld [vmem:[#allocation9_spill] sm:$0xff]  ;;  %3047 = vst.msk [vmem:[%s5903_s4 + $0x18] sm:$0xf] %vm3039_vm9, %v4910_v44 }
  0x85   : > { %v5664_v32 = vcombine.low %v1889_v20, %v1899_v34  ;;  %v6469_v38 = vld [vmem:[#allocation10_spill] sm:$0xff]  ;;  %v6470_v11 = vld [vmem:[#allocation11_spill] sm:$0xff]  ;;  %v6473_v20 = vld [vmem:[#allocation17_spill] sm:$0xff]  ;;  %v2517_v4 = vshrl.u32 %v5746_v33, 16  ;;  %3040 = vst.msk [vmem:[%s5903_s4] sm:$0xf] %vm3039_vm9, %v4910_v44 }
  0x86   : > { %v1274_v21 = vsel %vm5215_vm8, %v1272_v3, %v1273_v51  ;;  %v6472_v59 = vld [vmem:[#allocation15_spill] sm:$0xff]  ;;  %v295_v47 = vld [vmem:[%s4987_s28 + $0xd4] sm:$0x1]  ;;  %v6476_v61 = vld [vmem:[#allocation22_spill] sm:$0xff]  ;;  %3041 = vst.msk [vmem:[%s5903_s4 + $0x4] sm:$0xf] %vm3039_vm9, %v4910_v44 }
  0x87   : > { %v3804_v52 = vcombine.low %v1271_v30, %v1274_v21  ;;  %v6474_v34 = vld [vmem:[#allocation19_spill] sm:$0xff]  ;;  %v2536_v30 = vshll.u32 %v295_v47, 16  ;;  %3044 = vst.msk [vmem:[%s5903_s4 + $0xc] sm:$0xf] %vm3039_vm9, %v4910_v44  ;;  %3045 = vst.msk [vmem:[%s5903_s4 + $0x10] sm:$0xf] %vm3039_vm9, %v4910_v44 }
  0x88   : > { %4285 = vmatmul.mubr.msk.bf16.gmra.mrb[8].mxu1 %vm740_vm4, %v5627_v58  ;;  %4437 = vmatmul.mubr.msk.bf16.gmra.mrb[24].mxu0 %vm740_vm4, %v5629_v23  ;;  %3048 = vst.msk [vmem:[%s5903_s4 + $0x1c] sm:$0xf] %vm3039_vm9, %v4910_v44  ;;  %3050 = vst.msk [vmem:[%s5903_s4 + $0x24] sm:$0xf] %vm3039_vm9, %v4910_v44 }
  0x89   : > { %4288 = vmatprep.mubr.msk.bf16.mxu1 %vm740_vm4, %v5633_v49  ;;  %4440 = vmatprep.mubr.msk.bf16.mxu0 %vm740_vm4, %v5639_v12  ;;  %3051 = vst.msk [vmem:[%s5903_s4 + $0x28] sm:$0xf] %vm3039_vm9, %v4910_v44  ;;  %3053 = vst.msk [vmem:[%s5903_s4 + $0x30] sm:$0xf] %vm3039_vm9, %v4910_v44 }
  0x8a   : > { %3054 = vst.msk [vmem:[%s5903_s4 + $0x34] sm:$0xf] %vm3039_vm9, %v4910_v44  ;;  %3056 = vst.msk [vmem:[%s5903_s4 + $0x3c] sm:$0xf] %vm3039_vm9, %v4910_v44 }
  0x8b   : > { %3057 = vst.msk [vmem:[%s5903_s4 + $0x40] sm:$0xf] %vm3039_vm9, %v4910_v44  ;;  %3059 = vst.msk [vmem:[%s5903_s4 + $0x48] sm:$0xf] %vm3039_vm9, %v4910_v44 }
  0x8c   : > { %3060 = vst.msk [vmem:[%s5903_s4 + $0x4c] sm:$0xf] %vm3039_vm9, %v4910_v44  ;;  %3062 = vst.msk [vmem:[%s5903_s4 + $0x54] sm:$0xf] %vm3039_vm9, %v4910_v44 }
  0x8d   : > { %3063 = vst.msk [vmem:[%s5903_s4 + $0x58] sm:$0xf] %vm3039_vm9, %v4910_v44  ;;  %3065 = vst.msk [vmem:[%s5903_s4 + $0x60] sm:$0xf] %vm3039_vm9, %v4910_v44 }
  0x8e   : > { %3066 = vst.msk [vmem:[%s5903_s4 + $0x64] sm:$0xf] %vm3039_vm9, %v4910_v44  ;;  %3068 = vst.msk [vmem:[%s5903_s4 + $0x6c] sm:$0xf] %vm3039_vm9, %v4910_v44 }
  0x8f   : > { %3069 = vst.msk [vmem:[%s5903_s4 + $0x70] sm:$0xf] %vm3039_vm9, %v4910_v44  ;;  %3071 = vst.msk [vmem:[%s5903_s4 + $0x78] sm:$0xf] %vm3039_vm9, %v4910_v44 }
  0x90   : > { %4289 = vmatmul.mubr.msk.bf16.gmra.mrb[12].mxu1 %vm740_vm4, %v5656_v5  ;;  %4441 = vmatmul.mubr.msk.bf16.gmra.mrb[28].mxu0 %vm740_vm4, %v5658_v39  ;;  %3072 = vst.msk [vmem:[%s5903_s4 + $0x7c] sm:$0xf] %vm3039_vm9, %v4910_v44  ;;  %3074 = vst.msk [vmem:[%s5903_s4 + $0x84] sm:$0xf] %vm3039_vm9, %v4910_v44 }
  0x91   : > { %4292 = vmatprep.mubr.msk.bf16.mxu1 %vm740_vm4, %v5550_v17  ;;  %4446 = vmatprep.mubr.msk.bf16.mxu0 %vm740_vm4, %v5523_v62  ;;  %3075 = vst.msk [vmem:[%s5903_s4 + $0x88] sm:$0xf] %vm3039_vm9, %v4910_v44  ;;  %3077 = vst.msk [vmem:[%s5903_s4 + $0x90] sm:$0xf] %vm3039_vm9, %v4910_v44 }
  0x92   : > { %3078 = vst.msk [vmem:[%s5903_s4 + $0x94] sm:$0xf] %vm3039_vm9, %v4910_v44  ;;  %3080 = vst.msk [vmem:[%s5903_s4 + $0x9c] sm:$0xf] %vm3039_vm9, %v4910_v44 }
  0x93   : > { %3081 = vst.msk [vmem:[%s5903_s4 + $0xa0] sm:$0xf] %vm3039_vm9, %v4910_v44  ;;  %3083 = vst.msk [vmem:[%s5903_s4 + $0xa8] sm:$0xf] %vm3039_vm9, %v4910_v44 }
  0x94   : > { %3084 = vst.msk [vmem:[%s5903_s4 + $0xac] sm:$0xf] %vm3039_vm9, %v4910_v44  ;;  %3086 = vst.msk [vmem:[%s5903_s4 + $0xb4] sm:$0xf] %vm3039_vm9, %v4910_v44 }
  0x95   : > { %3087 = vst.msk [vmem:[%s5903_s4 + $0xb8] sm:$0xf] %vm3039_vm9, %v4910_v44  ;;  %3089 = vst.msk [vmem:[%s5903_s4 + $0xc0] sm:$0xf] %vm3039_vm9, %v4910_v44 }
  0x96   : > { %3090 = vst.msk [vmem:[%s5903_s4 + $0xc4] sm:$0xf] %vm3039_vm9, %v4910_v44  ;;  %3092 = vst.msk [vmem:[%s5903_s4 + $0xcc] sm:$0xf] %vm3039_vm9, %v4910_v44 }
  0x97   : > { %3093 = vst.msk [vmem:[%s5903_s4 + $0xd0] sm:$0xf] %vm3039_vm9, %v4910_v44 }
  0x98   : > { %4293 = vmatmul.mubr.msk.bf16.gmra.mrb[16].mxu1 %vm740_vm4, %v5559_v0  ;;  %4447 = vmatmul.mubr.msk.bf16.vlgmr.msra.gmra.mrb[0].mxu0 %vm740_vm4, %v5543_v9  ;;  %3049 = vst.msk [vmem:[%s5903_s4 + $0x20] sm:$0x1] %vm3042_vm10, %v4910_v44  ;;  %3043 = vst.msk [vmem:[%s5903_s4 + $0x8] sm:$0x1] %vm3042_vm10, %v4910_v44 }
  0x99   : > { %4479 = vmatpush3.bf16.msra.mxu0 %v6457_v36  ;;  %4296 = vmatprep.mubr.msk.bf16.mxu1 %vm740_vm4, %v5563_v7  ;;  %v2530_v36 = vshrl.u32 %v5749_v14, 16  ;;  %3046 = vst.msk [vmem:[%s5903_s4 + $0x14] sm:$0x1] %vm3042_vm10, %v4910_v44  ;;  %3052 = vst.msk [vmem:[%s5903_s4 + $0x2c] sm:$0x1] %vm3042_vm10, %v4910_v44 }
  0x9a   : > { %4450 = vmatprep.mubr.msk.bf16.mxu0 %vm740_vm4, %v5591_v63  ;;  %4512 = vmatprep.subr.bf16.mxu0 %v2757_v22  ;;  %3055 = vst.msk [vmem:[%s5903_s4 + $0x38] sm:$0x1] %vm3042_vm10, %v4910_v44  ;;  %3058 = vst.msk [vmem:[%s5903_s4 + $0x44] sm:$0x1] %vm3042_vm10, %v4910_v44 }
  0x9b   : > { %v2532_v51 = vrot.slane %v2530_v36, 4  ;;  %3061 = vst.msk [vmem:[%s5903_s4 + $0x50] sm:$0x1] %vm3042_vm10, %v4910_v44  ;;  %3064 = vst.msk [vmem:[%s5903_s4 + $0x5c] sm:$0x1] %vm3042_vm10, %v4910_v44 }
  0x9c   : > { %3067 = vst.msk [vmem:[%s5903_s4 + $0x68] sm:$0x1] %vm3042_vm10, %v4910_v44  ;;  %3070 = vst.msk [vmem:[%s5903_s4 + $0x74] sm:$0x1] %vm3042_vm10, %v4910_v44 }
  0x9d   : > { %3073 = vst.msk [vmem:[%s5903_s4 + $0x80] sm:$0x1] %vm3042_vm10, %v4910_v44  ;;  %3076 = vst.msk [vmem:[%s5903_s4 + $0x8c] sm:$0x1] %vm3042_vm10, %v4910_v44 }
  0x9e   : > { %3079 = vst.msk [vmem:[%s5903_s4 + $0x98] sm:$0x1] %vm3042_vm10, %v4910_v44  ;;  %3082 = vst.msk [vmem:[%s5903_s4 + $0xa4] sm:$0x1] %vm3042_vm10, %v4910_v44 }
  0x9f   : > { %3085 = vst.msk [vmem:[%s5903_s4 + $0xb0] sm:$0x1] %vm3042_vm10, %v4910_v44  ;;  %3088 = vst.msk [vmem:[%s5903_s4 + $0xbc] sm:$0x1] %vm3042_vm10, %v4910_v44 }
  0xa0   : > { %4297 = vmatmul.mubr.msk.bf16.gmra.mrb[20].mxu1 %vm740_vm4, %v5571_v18  ;;  %4451 = vmatmul.mubr.msk.bf16.gmra.mrb[4].mxu0 %vm740_vm4, %v5627_v58  ;;  %3091 = vst.msk [vmem:[%s5903_s4 + $0xc8] sm:$0x1] %vm3042_vm10, %v4910_v44  ;;  %3094 = vst.msk [vmem:[%s5903_s4 + $0xd4] sm:$0x1] %vm3042_vm10, %v4910_v44 }
  0xa1   : > { %4300 = vmatprep.mubr.msk.bf16.mxu1 %vm740_vm4, %v5575_v54  ;;  %4454 = vmatprep.mubr.msk.bf16.mxu0 %vm740_vm4, %v5633_v49 }
  0xa8   : > { %4301 = vmatmul.mubr.msk.bf16.gmra.mrb[24].mxu1 %vm740_vm4, %v5579_v1  ;;  %4455 = vmatmul.mubr.msk.bf16.gmra.mrb[8].mxu0 %vm740_vm4, %v5656_v5 }
  0xa9   : > { %4304 = vmatprep.mubr.msk.bf16.mxu1 %vm740_vm4, %v5583_v57  ;;  %4458 = vmatprep.mubr.msk.bf16.mxu0 %vm740_vm4, %v5550_v17 }
  0xb0   : > { %4305 = vmatmul.mubr.msk.bf16.gmra.mrb[28].mxu1 %vm740_vm4, %v5587_v8  ;;  %4459 = vmatmul.mubr.msk.bf16.gmra.mrb[12].mxu0 %vm740_vm4, %v5559_v0 }
  0xb1   : > { %4310 = vmatprep.mubr.msk.bf16.mxu1 %vm740_vm4, %v3804_v52  ;;  %4462 = vmatprep.mubr.msk.bf16.mxu0 %vm740_vm4, %v5563_v7 }
  0xb8   : > { %4311 = vmatmul.mubr.msk.bf16.vlgmr.msra.gmra.mrb[0].mxu1 %vm740_vm4, %v6458_v56  ;;  %4463 = vmatmul.mubr.msk.bf16.gmra.mrb[16].mxu0 %vm740_vm4, %v5571_v18  ;;  %v2538_v56 = vrot.slane %v2536_v30, 5 }
  0xb9   : > { %4343 = vmatpush3.bf16.msra.mxu1 %v5596_v19  ;;  %4314 = vmatprep.mubr.msk.bf16.mxu1 %vm740_vm4, %v6459_v60  ;;  %v5735_v19 = vcombine.low %v5622_v6, %v5601_v16  ;;  %v3888_v16 = vcombine.low %v5746_v33, %v5749_v14  ;;  %v6465_v6 = vld [vmem:[#allocation4_spill] sm:$0xff] }
  0xba   : > { %4466 = vmatprep.mubr.msk.bf16.mxu0 %vm740_vm4, %v5575_v54  ;;  %4546 = vmatprep.subr.bf16.mxu1 %v6460_v53 }
  0xc0   : > { %4315 = vmatmul.mubr.msk.bf16.gmra.mrb[4].mxu1 %vm740_vm4, %v6461_v35  ;;  %4467 = vmatmul.mubr.msk.bf16.gmra.mrb[20].mxu0 %vm740_vm4, %v5579_v1 }
  0xc1   : > { %4318 = vmatprep.mubr.msk.bf16.mxu1 %vm740_vm4, %v6462_v29  ;;  %4470 = vmatprep.mubr.msk.bf16.mxu0 %vm740_vm4, %v5583_v57 }
  0xc8   : > { %4319 = vmatmul.mubr.msk.bf16.gmra.mrb[8].mxu1 %vm740_vm4, %v6463_v55  ;;  %4471 = vmatmul.mubr.msk.bf16.gmra.mrb[24].mxu0 %vm740_vm4, %v5587_v8 }
  0xc9   : > { %4322 = vmatprep.mubr.msk.bf16.mxu1 %vm740_vm4, %v6464_v28  ;;  %4474 = vmatprep.mubr.msk.bf16.mxu0 %vm740_vm4, %v5735_v19 }
  0xd0   : > { %4323 = vmatmul.mubr.msk.bf16.gmra.mrb[12].mxu1 %vm740_vm4, %v5460_v37  ;;  %4475 = vmatmul.mubr.msk.bf16.gmra.mrb[28].mxu0 %vm740_vm4, %v3888_v16 }
  0xd1   : > { %4326 = vmatprep.mubr.msk.bf16.mxu1 %vm740_vm4, %v5491_v10  ;;  %4480 = vmatprep.mubr.msk.bf16.mxu0 %vm740_vm4, %v6465_v6 }
  0xd8   : > { %4327 = vmatmul.mubr.msk.bf16.gmra.mrb[16].mxu1 %vm740_vm4, %v5495_v43  ;;  %4481 = vmatmul.mubr.msk.bf16.vlgmr.msra.gmra.mrb[0].mxu0 %vm740_vm4, %v6466_v15 }
  0xd9   : > { %4513 = vmatpush3.bf16.msra.mxu0 %v2757_v22  ;;  %4330 = vmatprep.mubr.msk.bf16.mxu1 %vm740_vm4, %v5517_v25  ;;  %v2520_v22 = vshll.u32 %v5746_v33, 16 }
  0xda   : > { %4484 = vmatprep.mubr.msk.bf16.mxu0 %vm740_vm4, %v6467_v40 }
  0xdb   : > { %v2522_v13 = vrot.slane %v2520_v22, 5 }
  0xe0   : > { %4331 = vmatmul.mubr.msk.bf16.gmra.mrb[20].mxu1 %vm740_vm4, %v5526_v27  ;;  %4485 = vmatmul.mubr.msk.bf16.gmra.mrb[4].mxu0 %vm740_vm4, %v6468_v46 }
  0xe1   : > { %4334 = vmatprep.mubr.msk.bf16.mxu1 %vm740_vm4, %v5566_v31  ;;  %4488 = vmatprep.mubr.msk.bf16.mxu0 %vm740_vm4, %v6469_v38 }
  0xe8   : > { %4335 = vmatmul.mubr.msk.bf16.gmra.mrb[24].mxu1 %vm740_vm4, %v5593_v24  ;;  %4489 = vmatmul.mubr.msk.bf16.gmra.mrb[8].mxu0 %vm740_vm4, %v6470_v11 }
  0xe9   : > { %4338 = vmatprep.mubr.msk.bf16.mxu1 %vm740_vm4, %v5629_v23  ;;  %4492 = vmatprep.mubr.msk.bf16.mxu0 %vm740_vm4, %v6471_v26 }
  0xf0   : > { %4339 = vmatmul.mubr.msk.bf16.gmra.mrb[28].mxu1 %vm740_vm4, %v5639_v12  ;;  %4493 = vmatmul.mubr.msk.bf16.gmra.mrb[12].mxu0 %vm740_vm4, %v6472_v59 }
  0xf1   : > { %4344 = vmatprep.mubr.msk.bf16.mxu1 %vm740_vm4, %v5047_v45  ;;  %4496 = vmatprep.mubr.msk.bf16.mxu0 %vm740_vm4, %v6473_v20  ;;  %v2526_v45 = vshll.u32 %v5749_v14, 16 }
  0xf3   : > { %v2528_v42 = vrot.slane %v2526_v45, 5 }
  0xf5   : > { %v2533_v3 = vor.u32 %v2532_v51, %v2528_v42 }
  0xf7   : > { %v2534_v52 = vrot.slane %v2533_v3, 4 }
  0xf8   : > { %4345 = vmatmul.mubr.msk.bf16.vlgmr.msra.gmra.mrb[0].mxu1 %vm740_vm4, %v5523_v62  ;;  %4497 = vmatmul.mubr.msk.bf16.gmra.mrb[16].mxu0 %vm740_vm4, %v6474_v34  ;;  %v2519_v62 = vrot.slane %v2517_v4, 4 }
  0xf9   : > { %4547 = vmatpush3.bf16.msra.mxu1 %v6460_v53  ;;  %4348 = vmatprep.mubr.msk.bf16.mxu1 %vm740_vm4, %v5543_v9 }
  0xfa   : > { %4500 = vmatprep.mubr.msk.bf16.mxu0 %vm740_vm4, %v6475_v2  ;;  %v2523_v9 = vor.u32 %v2522_v13, %v2519_v62 }
  0xfc   : > { %v2524_v21 = vrot.slane %v2523_v9, 4 }
 0x100   : > { %4349 = vmatmul.mubr.msk.bf16.gmra.mrb[4].mxu1 %vm740_vm4, %v5591_v63  ;;  %4501 = vmatmul.mubr.msk.bf16.gmra.mrb[20].mxu0 %vm740_vm4, %v6476_v61  ;;  %v2529_v63 = vsel %vm5041_vm5, %v2524_v21, %v2528_v42 }
 0x101   : > { %4352 = vmatprep.mubr.msk.bf16.mxu1 %vm740_vm4, %v5627_v58  ;;  %4504 = vmatprep.mubr.msk.bf16.mxu0 %vm740_vm4, %v5462_v48  ;;  %v2539_v58 = vsel %vm5041_vm5, %v2534_v52, %v2538_v56  ;;  %v3978_v56 = vld [vmem:[%s5903_s4 + $0x18] sm:$0xf] }
 0x102   : > { %v3905_v53 = vcombine.low %v2529_v63, %v2539_v58 }
 0x108   : > { %4353 = vmatmul.mubr.msk.bf16.gmra.mrb[8].mxu1 %vm740_vm4, %v5633_v49  ;;  %4505 = vmatmul.mubr.msk.bf16.gmra.mrb[24].mxu0 %vm740_vm4, %v5489_v50 }
 0x109   : > { %4356 = vmatprep.mubr.msk.bf16.mxu1 %vm740_vm4, %v5656_v5  ;;  %4508 = vmatprep.mubr.msk.bf16.mxu0 %vm740_vm4, %v5664_v32 }
 0x110   : > { %4357 = vmatmul.mubr.msk.bf16.gmra.mrb[12].mxu1 %vm740_vm4, %v5550_v17  ;;  %4509 = vmatmul.mubr.msk.bf16.gmra.mrb[28].mxu0 %vm740_vm4, %v3905_v53 }
 0x111   : > { %4360 = vmatprep.mubr.msk.bf16.mxu1 %vm740_vm4, %v5559_v0  ;;  %4514 = vmatprep.mubr.msk.bf16.mxu0 %vm740_vm4, %v6459_v60 }
 0x118   : > { %4361 = vmatmul.mubr.msk.bf16.gmra.mrb[16].mxu1 %vm740_vm4, %v5563_v7  ;;  %4515 = vmatmul.mubr.msk.bf16.vlgmr.msra.gmra.mrb[0].mxu0 %vm740_vm4, %v6461_v35 }
 0x119   : > { %4364 = vmatprep.mubr.msk.bf16.mxu1 %vm740_vm4, %v5571_v18  ;;  %4518 = vmatprep.mubr.msk.bf16.mxu0 %vm740_vm4, %v6462_v29 }
 0x120   : > { %4365 = vmatmul.mubr.msk.bf16.gmra.mrb[20].mxu1 %vm740_vm4, %v5575_v54  ;;  %4519 = vmatmul.mubr.msk.bf16.gmra.mrb[4].mxu0 %vm740_vm4, %v6463_v55 }
 0x121   : > { %4368 = vmatprep.mubr.msk.bf16.mxu1 %vm740_vm4, %v5579_v1  ;;  %4522 = vmatprep.mubr.msk.bf16.mxu0 %vm740_vm4, %v6464_v28 }
 0x128   : > { %4369 = vmatmul.mubr.msk.bf16.gmra.mrb[24].mxu1 %vm740_vm4, %v5583_v57  ;;  %4523 = vmatmul.mubr.msk.bf16.gmra.mrb[8].mxu0 %vm740_vm4, %v5460_v37  ;;  %v3922_v37 = vrot.slane %v5746_v33, 9 }
 0x129   : > { %4372 = vmatprep.mubr.msk.bf16.mxu1 %vm740_vm4, %v5587_v8  ;;  %4526 = vmatprep.mubr.msk.bf16.mxu0 %vm740_vm4, %v5491_v10  ;;  %v2747_v10 = vrot.slane %v2745_v41, 4 }
 0x130   : > { %4373 = vmatmul.mubr.msk.bf16.gmra.mrb[28].mxu1 %vm740_vm4, %v5735_v19  ;;  %4527 = vmatmul.mubr.msk.bf16.gmra.mrb[12].mxu0 %vm740_vm4, %v5495_v43  ;;  %v2748_v43 = vrot.slane %v295_v47, 5 }
 0x131   : > { %4394 = vmatprep.mubr.msk.bf16.mxu1 %vm740_vm4, %v6472_v59  ;;  %4530 = vmatprep.mubr.msk.bf16.mxu0 %vm740_vm4, %v5517_v25  ;;  %v2746_v25 = vsel %vm5215_vm8, %v3922_v37, %v2745_v41 }
 0x138   : > { %4395 = vmatmul.mubr.msk.bf16.vlgmr.msra.gmra.mrb[16].mxu1 %vm740_vm4, %v6473_v20  ;;  %4531 = vmatmul.mubr.msk.bf16.gmra.mrb[16].mxu0 %vm740_vm4, %v5526_v27  ;;  %v2749_v27 = vsel %vm5215_vm8, %v2747_v10, %v2748_v43  ;;  %v3973_v43 = vld [vmem:[%s5903_s4 + $0xc] sm:$0xf] }
 0x139   : > { %4398 = vmatprep.mubr.msk.bf16.mxu1 %vm740_vm4, %v6474_v34  ;;  %4534 = vmatprep.mubr.msk.bf16.mxu0 %vm740_vm4, %v5566_v31  ;;  %v3923_v17 = vcombine.low %v2746_v25, %v2749_v27 }
 0x140   : > { %4399 = vmatmul.mubr.msk.bf16.gmra.mrb[20].mxu1 %vm740_vm4, %v6475_v2  ;;  %4535 = vmatmul.mubr.msk.bf16.gmra.mrb[20].mxu0 %vm740_vm4, %v5593_v24 }
 0x141   : > { %4402 = vmatprep.mubr.msk.bf16.mxu1 %vm740_vm4, %v6476_v61  ;;  %4538 = vmatprep.mubr.msk.bf16.mxu0 %vm740_vm4, %v5629_v23 }
 0x148   : > { %4403 = vmatmul.mubr.msk.bf16.gmra.mrb[24].mxu1 %vm740_vm4, %v5462_v48  ;;  %4539 = vmatmul.mubr.msk.bf16.gmra.mrb[24].mxu0 %vm740_vm4, %v5639_v12 }
 0x149   : > { %4406 = vmatprep.mubr.msk.bf16.mxu1 %vm740_vm4, %v5489_v50  ;;  %4542 = vmatprep.mubr.msk.bf16.mxu0 %vm740_vm4, %v5658_v39 }
 0x150   : > { %4407 = vmatmul.mubr.msk.bf16.gmra.mrb[28].mxu1 %vm740_vm4, %v5664_v32  ;;  %4543 = vmatmul.mubr.msk.bf16.gmra.mrb[28].mxu0 %vm740_vm4, %v3923_v17  ;;  %v6037_v32 = vld [vmem:[%s231_s7] ss:$0 sm:$0xff] }
 0x1cb   : > { %v4346_v48 = vpop.f32.mrb[0].mxu1 }
 0x1cc   : > { %v1717_v50 = vpop.f32.mrb[1].mxu1 }
 0x1cd   : > { %v4347_v0 = vpop.f32.mrb[2].mxu1 }
 0x1ce   : > { %v1720_v7 = vpop.f32.mrb[3].mxu1 }
 0x1d3   : > { %v4350_v31 = vpop.f32.mrb[4].mxu1 }
 0x1d4   : > { %v1733_v18 = vpop.f32.mrb[5].mxu1 }
 0x1d5   : > { %v6013_v54 = vpop.f32.mrb[6].mxu1 }
 0x1d6   : > { %v6015_v1 = vpop.f32.mrb[7].mxu1 }
 0x1db   : > { %v6017_v57 = vpop.f32.mrb[8].mxu1 }
 0x1dc   : > { %v6019_v8 = vpop.f32.mrb[9].mxu1 }
 0x1dd   : > { %v6021_v24 = vpop.f32.mrb[10].mxu1 }
 0x1de   : > { %v6023_v23 = vpop.f32.mrb[11].mxu1 }
 0x1e3   : > { %v6025_v49 = vpop.f32.mrb[12].mxu1 }
 0x1e4   : > { %v6027_v12 = vpop.f32.mrb[13].mxu1 }
 0x1e5   : > { %v6029_v5 = vpop.f32.mrb[14].mxu1 }
 0x1e6   : > { %v6031_v39 = vpop.f32.mrb[15].mxu1 }
 0x1eb   : > { %v4516_v60 = vpop.f32.mrb[0].mxu0 }
 0x1ec   : > { %v4548_v35 = vadd.f32 %v4516_v60, %v4346_v48  ;;  %v2793_v29 = vpop.f32.mrb[1].mxu0 }
 0x1ed   : > { %v4549_v19 = vadd.f32 %v2793_v29, %v1717_v50  ;;  %v4517_v55 = vpop.f32.mrb[2].mxu0  ;;  %v3976_v29 = vld [vmem:[%s5903_s4 + $0x14] sm:$0x1] }
 0x1ee   : > { %v2961_v28 = vadd.f32 %v4548_v35, %v6037_v32  ;;  %v4550_v33 = vadd.f32 %v4517_v55, %v4347_v0  ;;  %v2796_v14 = vpop.f32.mrb[3].mxu0  ;;  %v3981_v0 = vld [vmem:[%s5903_s4 + $0x20] sm:$0x1] }
 0x1ef   : > { %v2959_v16 = vadd.f32 %v4549_v19, %v6037_v32  ;;  %v4551_v6 = vadd.f32 %v2796_v14, %v1720_v7 }
 0x1f0   : > { %v2993_v15 = vmax.f32 %v2961_v28, 0.0  ;;  %v2962_v40 = vadd.f32 %v4550_v33, %v6037_v32 }
 0x1f1   : > { %v2991_v46 = vmax.f32 %v2959_v16, 0.0  ;;  %v2960_v38 = vadd.f32 %v4551_v6, %v6037_v32 }
 0x1f2   : > { %v4057_v11 = vpack.c.bf16 %v2993_v15, %v2993_v15  ;;  %v2994_v26 = vmax.f32 %v2962_v40, 0.0 }
 0x1f3   : > { %v4055_v59 = vpack.c.bf16 %v2991_v46, %v2991_v46  ;;  %v2992_v20 = vmax.f32 %v2960_v38, 0.0  ;;  %v4520_v34 = vpop.f32.mrb[4].mxu0 }
 0x1f4   : > { %v3196_v4 = vshrl.u32 %v4057_v11, 16  ;;  %v3199_v22 = vshll.u32 %v4057_v11, 16  ;;  %v4058_v36 = vpack.c.bf16 %v2994_v26, %v2994_v26  ;;  %v4552_v45 = vadd.f32 %v4520_v34, %v4350_v31  ;;  %v2809_v2 = vpop.f32.mrb[5].mxu0 }
 0x1f5   : > { %v3179_v62 = vshrl.u32 %v4055_v59, 16  ;;  %v3182_v13 = vshll.u32 %v4055_v59, 16  ;;  %v4056_v42 = vpack.c.bf16 %v2992_v20, %v2992_v20  ;;  %v4553_v51 = vadd.f32 %v2809_v2, %v1733_v18  ;;  %v4521_v47 = vpop.f32.mrb[6].mxu0 }
 0x1f6   : > { %v3198_v61 = vrot.slane %v3196_v4, 7  ;;  %v3204_v9 = vshrl.u32 %v4058_v36, 16  ;;  %v3207_v3 = vshll.u32 %v4058_v36, 16  ;;  %v2965_v30 = vadd.f32 %v4552_v45, %v6037_v32  ;;  %v2812_v21 = vpop.f32.mrb[7].mxu0 }
 0x1f7   : > { %v3181_v63 = vrot.slane %v3179_v62, 7  ;;  %v3187_v58 = vshrl.u32 %v4056_v42, 16  ;;  %v3190_v53 = vshll.u32 %v4056_v42, 16  ;;  %v2963_v41 = vadd.f32 %v4553_v51, %v6037_v32  ;;  %v3988_v62 = vld [vmem:[%s5903_s4 + $0x30] sm:$0xf] }
 0x1f8   : > { %v3201_v37 = vor.u32 %v3199_v22, %v3198_v61  ;;  %v3202_v10 = vrot.slane %v3198_v61, 4  ;;  %v3206_v27 = vrot.slane %v3204_v9, 7  ;;  %v2997_v17 = vmax.f32 %v2965_v30, 0.0 }
 0x1f9   : > { %v3184_v44 = vor.u32 %v3182_v13, %v3181_v63  ;;  %v3185_v48 = vrot.slane %v3181_v63, 4  ;;  %v3189_v7 = vrot.slane %v3187_v58, 7  ;;  %v2995_v31 = vmax.f32 %v2963_v41, 0.0 }
 0x1fa   : > { %v3512_v18 = vsel %vm6046_vm14, %v3201_v37, %v3978_v56  ;;  %v3209_v60 = vor.u32 %v3207_v3, %v3206_v27  ;;  %v3211_v35 = vrot.slane %v3206_v27, 4  ;;  %v4061_v19 = vpack.c.bf16 %v2997_v17, %v2997_v17 }
 0x1fb   : > { %3979 = vst [vmem:[%s5903_s4 + $0x18] sm:$0xf] %v3512_v18  ;;  %v3503_v55 = vsel %vm6046_vm14, %v3184_v44, %v3973_v43  ;;  %v3192_v28 = vor.u32 %v3190_v53, %v3189_v7  ;;  %v3194_v33 = vrot.slane %v3189_v7, 4  ;;  %v4059_v14 = vpack.c.bf16 %v2995_v31, %v2995_v31  ;;  %v4524_v16 = vpop.f32.mrb[8].mxu0 }
 0x1fc   : > { %3974 = vst [vmem:[%s5903_s4 + $0xc] sm:$0xf] %v3503_v55  ;;  %v3210_v6 = vsel %vm6055_vm15, %v3202_v10, %v3209_v60  ;;  %v3516_v15 = vsel %vm6061_vm0, %v3211_v35, %v3981_v0  ;;  %v3230_v40 = vshrl.u32 %v4061_v19, 16  ;;  %v3233_v46 = vshll.u32 %v4061_v19, 16  ;;  %v2825_v38 = vpop.f32.mrb[9].mxu0 }
 0x1fd   : > { %3980 = vst.msk [vmem:[%s5903_s4 + $0x1c] sm:$0xf] %vm3039_vm9, %v3210_v6  ;;  %3982 = vst [vmem:[%s5903_s4 + $0x20] sm:$0x1] %v3516_v15  ;;  %v3193_v11 = vsel %vm6055_vm15, %v3185_v48, %v3192_v28  ;;  %v3509_v26 = vsel %vm6061_vm0, %v3194_v33, %v3976_v29  ;;  %v3213_v59 = vshrl.u32 %v4059_v14, 16  ;;  %v3216_v20 = vshll.u32 %v4059_v14, 16 }
 0x1fe   : > { %v4525_v34 = vpop.f32.mrb[10].mxu0  ;;  %3975 = vst.msk [vmem:[%s5903_s4 + $0x10] sm:$0xf] %vm3039_vm9, %v3193_v11  ;;  %3977 = vst [vmem:[%s5903_s4 + $0x14] sm:$0x1] %v3509_v26  ;;  %v6087_v4 = vrot.slane %v3230_v40, 7  ;;  %v4554_v22 = vadd.f32 %v4521_v47, %v6013_v54  ;;  %v4555_v36 = vadd.f32 %v2812_v21, %v6015_v1  ;;  %v4556_v45 = vadd.f32 %v4524_v16, %v6017_v57 }
 0x1ff   : > { %v2828_v2 = vpop.f32.mrb[11].mxu0  ;;  %v6093_v13 = vrot.slane %v3213_v59, 7  ;;  %v4557_v42 = vadd.f32 %v2825_v38, %v6019_v8  ;;  %v4558_v51 = vadd.f32 %v4525_v34, %v6021_v24  ;;  %v3983_v54 = vld [vmem:[%s5903_s4 + $0x24] sm:$0xf]  ;;  %v3991_v38 = vld [vmem:[%s5903_s4 + $0x38] sm:$0x1] }
 0x200   : > { %v4559_v61 = vadd.f32 %v2828_v2, %v6023_v23  ;;  %v3235_v9 = vor.u32 %v3233_v46, %v6087_v4  ;;  %v3236_v3 = vrot.slane %v6087_v4, 4  ;;  %v2966_v1 = vadd.f32 %v4554_v22, %v6037_v32  ;;  %v3986_v11 = vld [vmem:[%s5903_s4 + $0x2c] sm:$0x1]  ;;  %v3993_v2 = vld [vmem:[%s5903_s4 + $0x3c] sm:$0xf] }
 0x201   : > { %v2964_v57 = vadd.f32 %v4555_v36, %v6037_v32  ;;  %v3218_v47 = vor.u32 %v3216_v20, %v6093_v13  ;;  %v3219_v30 = vrot.slane %v6093_v13, 4  ;;  %v2969_v8 = vadd.f32 %v4556_v45, %v6037_v32  ;;  %v3998_v45 = vld [vmem:[%s5903_s4 + $0x48] sm:$0xf] }
 0x202   : > { %v2967_v24 = vadd.f32 %v4557_v42, %v6037_v32  ;;  %v3526_v23 = vsel %vm6046_vm14, %v3235_v9, %v3988_v62  ;;  %v2998_v21 = vmax.f32 %v2966_v1, 0.0  ;;  %v2970_v63 = vadd.f32 %v4558_v51, %v6037_v32 }
 0x203   : > { %v2996_v56 = vmax.f32 %v2964_v57, 0.0  ;;  %3989 = vst [vmem:[%s5903_s4 + $0x30] sm:$0xf] %v3526_v23  ;;  %v3519_v58 = vsel %vm6046_vm14, %v3218_v47, %v3983_v54  ;;  %v3001_v53 = vmax.f32 %v2969_v8, 0.0  ;;  %v2968_v37 = vadd.f32 %v4559_v61, %v6037_v32  ;;  %v4528_v10 = vpop.f32.mrb[12].mxu0 }
 0x204   : > { %v2999_v41 = vmax.f32 %v2967_v24, 0.0  ;;  %3984 = vst [vmem:[%s5903_s4 + $0x24] sm:$0xf] %v3519_v58  ;;  %v4062_v43 = vpack.c.bf16 %v2998_v21, %v2998_v21  ;;  %v3002_v17 = vmax.f32 %v2970_v63, 0.0  ;;  %v4560_v44 = vadd.f32 %v4528_v10, %v6025_v49  ;;  %v2841_v48 = vpop.f32.mrb[13].mxu0 }
 0x205   : > { %v4060_v27 = vpack.c.bf16 %v2996_v56, %v2996_v56  ;;  %v4065_v0 = vpack.c.bf16 %v3001_v53, %v3001_v53  ;;  %v3000_v31 = vmax.f32 %v2968_v37, 0.0  ;;  %v4561_v18 = vadd.f32 %v2841_v48, %v6027_v12  ;;  %v4529_v60 = vpop.f32.mrb[14].mxu0 }
 0x206   : > { %v4063_v7 = vpack.c.bf16 %v2999_v41, %v2999_v41  ;;  %v3238_v35 = vshrl.u32 %v4062_v43, 16  ;;  %v3241_v29 = vshll.u32 %v4062_v43, 16  ;;  %v2844_v28 = vpop.f32.mrb[15].mxu0  ;;  %v4066_v40 = vpack.c.bf16 %v3002_v17, %v3002_v17 }
 0x207   : > { %v3221_v19 = vshrl.u32 %v4060_v27, 16  ;;  %v3224_v55 = vshll.u32 %v4060_v27, 16  ;;  %v3264_v33 = vshrl.u32 %v4065_v0, 16  ;;  %v3267_v14 = vshll.u32 %v4065_v0, 16  ;;  %v4001_v0 = vld [vmem:[%s5903_s4 + $0x50] sm:$0x1] }
 0x208   : > { %v3247_v16 = vshrl.u32 %v4063_v7, 16  ;;  %v3250_v6 = vshll.u32 %v4063_v7, 16  ;;  %v3240_v49 = vrot.slane %v3238_v35, 7  ;;  %v4064_v46 = vpack.c.bf16 %v3000_v31, %v3000_v31 }
 0x209   : > { %v3223_v15 = vrot.slane %v3221_v19, 7  ;;  %v3266_v12 = vrot.slane %v3264_v33, 7  ;;  %v2973_v59 = vadd.f32 %v4560_v44, %v6037_v32  ;;  %v2971_v20 = vadd.f32 %v4561_v18, %v6037_v32 }
 0x20a   : > { %v6119_v26 = vrot.slane %v3247_v16, 7  ;;  %v3243_v34 = vor.u32 %v3241_v29, %v3240_v49  ;;  %v3245_v4 = vrot.slane %v3240_v49, 4  ;;  %v3272_v21 = vshrl.u32 %v4066_v40, 16 }
 0x20b   : > { %v3226_v22 = vor.u32 %v3224_v55, %v3223_v15  ;;  %v3228_v36 = vrot.slane %v3223_v15, 4  ;;  %v3269_v62 = vor.u32 %v3267_v14, %v3266_v12  ;;  %v3270_v13 = vrot.slane %v3266_v12, 4  ;;  %v4396_v61 = vpop.f32.mrb[16].mxu1  ;;  %v4532_v9 = vpop.f32.mrb[16].mxu0  ;;  %v3996_v55 = vld [vmem:[%s5903_s4 + $0x44] sm:$0x1] }
 0x20c   : > { %v3252_v42 = vor.u32 %v3250_v6, %v6119_v26  ;;  %v3253_v51 = vrot.slane %v6119_v26, 4  ;;  %v3244_v54 = vsel %vm6055_vm15, %v3236_v3, %v3243_v34  ;;  %v3530_v1 = vsel %vm6061_vm0, %v3245_v4, %v3991_v38  ;;  %v2007_v8 = vpop.f32.mrb[17].mxu1  ;;  %v2857_v24 = vpop.f32.mrb[17].mxu0  ;;  %v4008_v34 = vld [vmem:[%s5903_s4 + $0x60] sm:$0xf] }
 0x20d   : > { %v3227_v57 = vsel %vm6055_vm15, %v3219_v30, %v3226_v22  ;;  %v3523_v47 = vsel %vm6061_vm0, %v3228_v36, %v3986_v11  ;;  %3990 = vst.msk [vmem:[%s5903_s4 + $0x34] sm:$0xf] %vm3039_vm9, %v3244_v54  ;;  %3992 = vst [vmem:[%s5903_s4 + $0x38] sm:$0x1] %v3530_v1  ;;  %v3540_v3 = vsel %vm6046_vm14, %v3269_v62, %v3998_v45  ;;  %v3275_v30 = vshll.u32 %v4066_v40, 16  ;;  %v4397_v56 = vpop.f32.mrb[18].mxu1 }
 0x20e   : > { %3985 = vst.msk [vmem:[%s5903_s4 + $0x28] sm:$0xf] %vm3039_vm9, %v3227_v57  ;;  %3987 = vst [vmem:[%s5903_s4 + $0x2c] sm:$0x1] %v3523_v47  ;;  %v3533_v23 = vsel %vm6046_vm14, %v3252_v42, %v3993_v2  ;;  %v4533_v63 = vpop.f32.mrb[18].mxu0  ;;  %v3255_v58 = vshrl.u32 %v4064_v46, 16  ;;  %v4562_v17 = vadd.f32 %v4529_v60, %v6029_v5  ;;  %v4563_v44 = vadd.f32 %v2844_v28, %v6031_v39 }
 0x20f   : > { %3999 = vst [vmem:[%s5903_s4 + $0x48] sm:$0xf] %v3540_v3  ;;  %3994 = vst [vmem:[%s5903_s4 + $0x3c] sm:$0xf] %v3533_v23  ;;  %v3258_v53 = vshll.u32 %v4064_v46, 16  ;;  %v3005_v41 = vmax.f32 %v2973_v59, 0.0  ;;  %v4564_v48 = vadd.f32 %v4532_v9, %v4396_v61  ;;  %v4565_v35 = vadd.f32 %v2857_v24, %v2007_v8 }
 0x210   : > { %v3003_v37 = vmax.f32 %v2971_v20, 0.0  ;;  %v6147_v10 = vpop.f32.mrb[19].mxu1  ;;  %v6149_v43 = vpop.f32.mrb[19].mxu0  ;;  %v3274_v27 = vrot.slane %v3272_v21, 7  ;;  %v3257_v7 = vrot.slane %v3255_v58, 7  ;;  %v2974_v33 = vadd.f32 %v4562_v17, %v6037_v32 }
 0x211   : > { %v4069_v31 = vpack.c.bf16 %v3005_v41, %v3005_v41  ;;  %v2972_v14 = vadd.f32 %v4563_v44, %v6037_v32  ;;  %v2977_v36 = vadd.f32 %v4564_v48, %v6037_v32  ;;  %v2975_v45 = vadd.f32 %v4565_v35, %v6037_v32 }
 0x212   : > { %v4067_v18 = vpack.c.bf16 %v3003_v37, %v3003_v37  ;;  %v3277_v29 = vor.u32 %v3275_v30, %v3274_v27  ;;  %v3279_v19 = vrot.slane %v3274_v27, 4  ;;  %v3260_v16 = vor.u32 %v3258_v53, %v3257_v7  ;;  %v4011_v37 = vld [vmem:[%s5903_s4 + $0x68] sm:$0x1]  ;;  %v4006_v27 = vld [vmem:[%s5903_s4 + $0x5c] sm:$0x1] }
 0x213   : > { %v3262_v6 = vrot.slane %v3257_v7, 4  ;;  %v3298_v5 = vshrl.u32 %v4069_v31, 16  ;;  %v3301_v39 = vshll.u32 %v4069_v31, 16  ;;  %v4400_v40 = vpop.f32.mrb[20].mxu1  ;;  %v4536_v46 = vpop.f32.mrb[20].mxu0  ;;  %v3006_v26 = vmax.f32 %v2974_v33, 0.0 }
 0x214   : > { %v3278_v60 = vsel %vm6055_vm15, %v3270_v13, %v3277_v29  ;;  %v3544_v28 = vsel %vm6061_vm0, %v3279_v19, %v4001_v0  ;;  %v3281_v49 = vshrl.u32 %v4067_v18, 16  ;;  %v3284_v15 = vshll.u32 %v4067_v18, 16  ;;  %v6168_v59 = vpop.f32.mrb[21].mxu1  ;;  %v6170_v20 = vpop.f32.mrb[21].mxu0 }
 0x215   : > { %4000 = vst.msk [vmem:[%s5903_s4 + $0x4c] sm:$0xf] %vm3039_vm9, %v3278_v60  ;;  %4002 = vst [vmem:[%s5903_s4 + $0x50] sm:$0x1] %v3544_v28  ;;  %v3261_v38 = vsel %vm6055_vm15, %v3253_v51, %v3260_v16  ;;  %v3537_v11 = vsel %vm6061_vm0, %v3262_v6, %v3996_v55  ;;  %v3300_v12 = vrot.slane %v3298_v5, 7  ;;  %v3004_v22 = vmax.f32 %v2972_v14, 0.0 }
 0x216   : > { %3995 = vst.msk [vmem:[%s5903_s4 + $0x40] sm:$0xf] %vm3039_vm9, %v3261_v38  ;;  %3997 = vst [vmem:[%s5903_s4 + $0x44] sm:$0x1] %v3537_v11  ;;  %v3283_v4 = vrot.slane %v3281_v49, 7  ;;  %v6178_v2 = vpop.f32.mrb[22].mxu1  ;;  %v4070_v61 = vpack.c.bf16 %v3006_v26, %v3006_v26  ;;  %v4566_v9 = vadd.f32 %v4533_v63, %v4397_v56  ;;  %v4567_v48 = vadd.f32 %v6149_v43, %v6147_v10 }
 0x217   : > { %v6180_v62 = vpop.f32.mrb[22].mxu0  ;;  %v3303_v13 = vor.u32 %v3301_v39, %v3300_v12  ;;  %v3304_v42 = vrot.slane %v3300_v12, 4  ;;  %v4003_v51 = vld [vmem:[%s5903_s4 + $0x54] sm:$0xf]  ;;  %v6183_v54 = vpop.f32.mrb[23].mxu1  ;;  %v4068_v8 = vpack.c.bf16 %v3004_v22, %v3004_v22  ;;  %v3009_v24 = vmax.f32 %v2977_v36, 0.0 }
 0x218   : > { %v6185_v1 = vpop.f32.mrb[23].mxu0  ;;  %v3286_v57 = vor.u32 %v3284_v15, %v3283_v4  ;;  %v3287_v47 = vrot.slane %v3283_v4, 4  ;;  %v3306_v23 = vshrl.u32 %v4070_v61, 16  ;;  %v3309_v21 = vshll.u32 %v4070_v61, 16  ;;  %v4013_v36 = vld [vmem:[%s5903_s4 + $0x6c] sm:$0xf] }
 0x219   : > { %v3554_v3 = vsel %vm6046_vm14, %v3303_v13, %v4008_v34  ;;  %v3007_v30 = vmax.f32 %v2975_v45, 0.0  ;;  %v3289_v63 = vshrl.u32 %v4068_v8, 16  ;;  %v3292_v58 = vshll.u32 %v4068_v8, 16 }
 0x21a   : > { %4009 = vst [vmem:[%s5903_s4 + $0x60] sm:$0xf] %v3554_v3  ;;  %v3547_v56 = vsel %vm6046_vm14, %v3286_v57, %v4003_v51  ;;  %v4073_v53 = vpack.c.bf16 %v3009_v24, %v3009_v24  ;;  %v3308_v41 = vrot.slane %v3306_v23, 7  ;;  %v2978_v44 = vadd.f32 %v4566_v9, %v6037_v32 }
 0x21b   : > { %4004 = vst [vmem:[%s5903_s4 + $0x54] sm:$0xf] %v3547_v56  ;;  %v4071_v17 = vpack.c.bf16 %v3007_v30, %v3007_v30  ;;  %v3291_v0 = vrot.slane %v3289_v63, 7  ;;  %v4568_v18 = vadd.f32 %v4536_v46, %v4400_v40  ;;  %v4404_v35 = vpop.f32.mrb[24].mxu1  ;;  %v4540_v29 = vpop.f32.mrb[24].mxu0  ;;  %v2976_v38 = vadd.f32 %v4567_v48, %v6037_v32 }
 0x21c   : > { %v3332_v7 = vshrl.u32 %v4073_v53, 16  ;;  %v3335_v31 = vshll.u32 %v4073_v53, 16  ;;  %v3311_v19 = vor.u32 %v3309_v21, %v3308_v41  ;;  %v3313_v55 = vrot.slane %v3308_v41, 4  ;;  %v6198_v16 = vpop.f32.mrb[25].mxu1  ;;  %v6200_v6 = vpop.f32.mrb[25].mxu0 }
 0x21d   : > { %v3315_v33 = vshrl.u32 %v4071_v17, 16  ;;  %v3318_v14 = vshll.u32 %v4071_v17, 16  ;;  %v3294_v5 = vor.u32 %v3292_v58, %v3291_v0  ;;  %v3296_v39 = vrot.slane %v3291_v0, 4  ;;  %v6204_v60 = vpop.f32.mrb[26].mxu1  ;;  %v6206_v28 = vpop.f32.mrb[26].mxu0 }
 0x21e   : > { %v6202_v10 = vrot.slane %v3332_v7, 7  ;;  %v3010_v43 = vmax.f32 %v2978_v44, 0.0  ;;  %v3312_v49 = vsel %vm6055_vm15, %v3304_v42, %v3311_v19  ;;  %v3558_v15 = vsel %vm6061_vm0, %v3313_v55, %v4011_v37  ;;  %v4018_v40 = vld [vmem:[%s5903_s4 + $0x78] sm:$0xf]  ;;  %v6216_v11 = vpop.f32.mrb[27].mxu1  ;;  %v6218_v12 = vpop.f32.mrb[27].mxu0 }
 0x21f   : > { %v6213_v46 = vrot.slane %v3315_v33, 7  ;;  %4010 = vst.msk [vmem:[%s5903_s4 + $0x64] sm:$0xf] %vm3039_vm9, %v3312_v49  ;;  %4012 = vst [vmem:[%s5903_s4 + $0x68] sm:$0x1] %v3558_v15  ;;  %v3295_v26 = vsel %vm6055_vm15, %v3287_v47, %v3294_v5  ;;  %v3551_v34 = vsel %vm6061_vm0, %v3296_v39, %v4006_v27  ;;  %v3008_v51 = vmax.f32 %v2976_v38, 0.0 }
 0x220   : > { %v3337_v4 = vor.u32 %v3335_v31, %v6202_v10  ;;  %v3338_v22 = vrot.slane %v6202_v10, 4  ;;  %4005 = vst.msk [vmem:[%s5903_s4 + $0x58] sm:$0xf] %vm3039_vm9, %v3295_v26  ;;  %4007 = vst [vmem:[%s5903_s4 + $0x5c] sm:$0x1] %v3551_v34  ;;  %v4074_v42 = vpack.c.bf16 %v3010_v43, %v3010_v43  ;;  %v2981_v9 = vadd.f32 %v4568_v18, %v6037_v32 }
 0x221   : > { %v3320_v45 = vor.u32 %v3318_v14, %v6213_v46  ;;  %v3321_v13 = vrot.slane %v6213_v46, 4  ;;  %v4569_v57 = vadd.f32 %v6170_v20, %v6168_v59  ;;  %v4570_v47 = vadd.f32 %v6180_v62, %v6178_v2  ;;  %v4021_v27 = vld [vmem:[%s5903_s4 + $0x80] sm:$0x1]  ;;  %v4016_v55 = vld [vmem:[%s5903_s4 + $0x74] sm:$0x1] }
 0x222   : > { %v3568_v61 = vsel %vm6046_vm14, %v3337_v4, %v4018_v40  ;;  %v3340_v24 = vshrl.u32 %v4074_v42, 16  ;;  %v3343_v3 = vshll.u32 %v4074_v42, 16  ;;  %v4072_v23 = vpack.c.bf16 %v3008_v51, %v3008_v51 }
 0x223   : > { %4019 = vst [vmem:[%s5903_s4 + $0x78] sm:$0xf] %v3568_v61  ;;  %v3561_v8 = vsel %vm6046_vm14, %v3320_v45, %v4013_v36  ;;  %v3013_v21 = vmax.f32 %v2981_v9, 0.0  ;;  %v2979_v30 = vadd.f32 %v4569_v57, %v6037_v32  ;;  %v2982_v56 = vadd.f32 %v4570_v47, %v6037_v32  ;;  %v6250_v20 = vpop.f32.mrb[28].mxu1  ;;  %v6252_v2 = vpop.f32.mrb[28].mxu0 }
 0x224   : > { %4014 = vst [vmem:[%s5903_s4 + $0x6c] sm:$0xf] %v3561_v8  ;;  %v4571_v59 = vadd.f32 %v6185_v1, %v6183_v54  ;;  %v3342_v62 = vrot.slane %v3340_v24, 7  ;;  %v3323_v63 = vshrl.u32 %v4072_v23, 16  ;;  %v3326_v58 = vshll.u32 %v4072_v23, 16  ;;  %v6254_v41 = vpop.f32.mrb[29].mxu1 }
 0x225   : > { %v4572_v53 = vadd.f32 %v4540_v29, %v4404_v35  ;;  %v6256_v37 = vpop.f32.mrb[29].mxu0  ;;  %v4077_v17 = vpack.c.bf16 %v3013_v21, %v3013_v21  ;;  %v3011_v44 = vmax.f32 %v2979_v30, 0.0  ;;  %v3014_v48 = vmax.f32 %v2982_v56, 0.0  ;;  %v6260_v54 = vpop.f32.mrb[30].mxu1  ;;  %v4023_v57 = vld [vmem:[%s5903_s4 + $0x84] sm:$0xf] }
 0x226   : > { %v2980_v0 = vadd.f32 %v4571_v59, %v6037_v32  ;;  %v6262_v1 = vpop.f32.mrb[30].mxu0  ;;  %v3345_v7 = vor.u32 %v3343_v3, %v3342_v62  ;;  %v3347_v31 = vrot.slane %v3342_v62, 4  ;;  %v3325_v18 = vrot.slane %v3323_v63, 7  ;;  %v6265_v29 = vpop.f32.mrb[31].mxu1  ;;  %v4031_v56 = vld [vmem:[%s5903_s4 + $0x98] sm:$0x1] }
 0x227   : > { %v2985_v35 = vadd.f32 %v4572_v53, %v6037_v32  ;;  %v6267_v19 = vpop.f32.mrb[31].mxu0  ;;  %v3366_v33 = vshrl.u32 %v4077_v17, 16  ;;  %v3369_v14 = vshll.u32 %v4077_v17, 16  ;;  %v4075_v5 = vpack.c.bf16 %v3011_v44, %v3011_v44 }
 0x228   : > { %v4078_v39 = vpack.c.bf16 %v3014_v48, %v3014_v48  ;;  %v3346_v10 = vsel %vm6055_vm15, %v3338_v22, %v3345_v7  ;;  %v3572_v43 = vsel %vm6061_vm0, %v3347_v31, %v4021_v27  ;;  %v3328_v49 = vor.u32 %v3326_v58, %v3325_v18  ;;  %v4028_v22 = vld [vmem:[%s5903_s4 + $0x90] sm:$0xf]  ;;  %v4026_v48 = vld [vmem:[%s5903_s4 + $0x8c] sm:$0x1] }
 0x229   : > { %v3330_v15 = vrot.slane %v3325_v18, 4  ;;  %4020 = vst.msk [vmem:[%s5903_s4 + $0x7c] sm:$0xf] %vm3039_vm9, %v3346_v10  ;;  %4022 = vst [vmem:[%s5903_s4 + $0x80] sm:$0x1] %v3572_v43  ;;  %v3368_v40 = vrot.slane %v3366_v33, 7  ;;  %v4574_v24 = vadd.f32 %v6206_v28, %v6204_v60  ;;  %v4575_v31 = vadd.f32 %v6218_v12, %v6216_v11 }
 0x22a   : > { %v3349_v46 = vshrl.u32 %v4075_v5, 16  ;;  %v3352_v38 = vshll.u32 %v4075_v5, 16  ;;  %v3374_v26 = vshrl.u32 %v4078_v39, 16  ;;  %v3329_v34 = vsel %vm6055_vm15, %v3321_v13, %v3328_v49  ;;  %v4038_v5 = vld [vmem:[%s5903_s4 + $0xa8] sm:$0xf] }
 0x22b   : > { %v3565_v4 = vsel %vm6061_vm0, %v3330_v15, %v4016_v55  ;;  %v3377_v36 = vshll.u32 %v4078_v39, 16  ;;  %v3012_v45 = vmax.f32 %v2980_v0, 0.0  ;;  %4015 = vst.msk [vmem:[%s5903_s4 + $0x70] sm:$0xf] %vm3039_vm9, %v3329_v34  ;;  %v3371_v42 = vor.u32 %v3369_v14, %v3368_v40 }
 0x22c   : > { %4017 = vst [vmem:[%s5903_s4 + $0x74] sm:$0x1] %v3565_v4  ;;  %v3372_v51 = vrot.slane %v3368_v40, 4  ;;  %v3351_v61 = vrot.slane %v3349_v46, 7  ;;  %v3376_v9 = vrot.slane %v3374_v26, 7  ;;  %v3017_v8 = vmax.f32 %v2985_v35, 0.0 }
 0x22d   : > { %v4076_v47 = vpack.c.bf16 %v3012_v45, %v3012_v45  ;;  %v4573_v13 = vadd.f32 %v6200_v6, %v6198_v16  ;;  %v3582_v3 = vsel %vm6046_vm14, %v3371_v42, %v4028_v22  ;;  %v2986_v28 = vadd.f32 %v4574_v24, %v6037_v32  ;;  %v4033_v45 = vld [vmem:[%s5903_s4 + $0x9c] sm:$0xf]  ;;  %v4041_v42 = vld [vmem:[%s5903_s4 + $0xb0] sm:$0x1] }
 0x22e   : > { %v3354_v23 = vor.u32 %v3352_v38, %v3351_v61  ;;  %v3355_v21 = vrot.slane %v3351_v61, 4  ;;  %v3379_v30 = vor.u32 %v3377_v36, %v3376_v9  ;;  %4029 = vst [vmem:[%s5903_s4 + $0x90] sm:$0xf] %v3582_v3  ;;  %v3381_v59 = vrot.slane %v3376_v9, 4 }
 0x22f   : > { %v3357_v62 = vshrl.u32 %v4076_v47, 16  ;;  %v3360_v63 = vshll.u32 %v4076_v47, 16  ;;  %v4081_v58 = vpack.c.bf16 %v3017_v8, %v3017_v8  ;;  %v2983_v60 = vadd.f32 %v4573_v13, %v6037_v32 }
 0x230   : > { %v3575_v16 = vsel %vm6046_vm14, %v3354_v23, %v4023_v57  ;;  %v3380_v6 = vsel %vm6055_vm15, %v3372_v51, %v3379_v30  ;;  %v3586_v53 = vsel %vm6061_vm0, %v3381_v59, %v4031_v56  ;;  %v3018_v7 = vmax.f32 %v2986_v28, 0.0 }
 0x231   : > { %4024 = vst [vmem:[%s5903_s4 + $0x84] sm:$0xf] %v3575_v16  ;;  %4030 = vst.msk [vmem:[%s5903_s4 + $0x94] sm:$0xf] %vm3039_vm9, %v3380_v6  ;;  %v3359_v27 = vrot.slane %v3357_v62, 7  ;;  %v3400_v17 = vshrl.u32 %v4081_v58, 16  ;;  %v4576_v18 = vadd.f32 %v6252_v2, %v6250_v20  ;;  %v4577_v14 = vadd.f32 %v6256_v37, %v6254_v41 }
 0x232   : > { %v3403_v44 = vshll.u32 %v4081_v58, 16  ;;  %4032 = vst [vmem:[%s5903_s4 + $0x98] sm:$0x1] %v3586_v53  ;;  %v3015_v0 = vmax.f32 %v2983_v60, 0.0  ;;  %v4082_v10 = vpack.c.bf16 %v3018_v7, %v3018_v7  ;;  %v2984_v43 = vadd.f32 %v4575_v31, %v6037_v32  ;;  %v4048_v58 = vld [vmem:[%s5903_s4 + $0xc0] sm:$0xf] }
 0x233   : > { %v3362_v35 = vor.u32 %v3360_v63, %v3359_v27  ;;  %v3364_v55 = vrot.slane %v3359_v27, 4  ;;  %v3402_v33 = vrot.slane %v3400_v17, 7  ;;  %v2989_v49 = vadd.f32 %v4576_v18, %v6037_v32  ;;  %v4036_v63 = vld [vmem:[%s5903_s4 + $0xa4] sm:$0x1]  ;;  %v4043_v31 = vld [vmem:[%s5903_s4 + $0xb4] sm:$0xf] }
 0x234   : > { %v4079_v39 = vpack.c.bf16 %v3015_v0, %v3015_v0  ;;  %v3408_v37 = vshrl.u32 %v4082_v10, 16  ;;  %v3411_v15 = vshll.u32 %v4082_v10, 16  ;;  %v3016_v46 = vmax.f32 %v2984_v43, 0.0 }
 0x235   : > { %v3363_v11 = vsel %vm6055_vm15, %v3355_v21, %v3362_v35  ;;  %v3579_v12 = vsel %vm6061_vm0, %v3364_v55, %v4026_v48  ;;  %v3405_v20 = vor.u32 %v3403_v44, %v3402_v33  ;;  %v3021_v38 = vmax.f32 %v2989_v49, 0.0 }
 0x236   : > { %4025 = vst.msk [vmem:[%s5903_s4 + $0x88] sm:$0xf] %vm3039_vm9, %v3363_v11  ;;  %4027 = vst [vmem:[%s5903_s4 + $0x8c] sm:$0x1] %v3579_v12  ;;  %v3383_v2 = vshrl.u32 %v4079_v39, 16  ;;  %v3386_v41 = vshll.u32 %v4079_v39, 16  ;;  %v2987_v26 = vadd.f32 %v4577_v14, %v6037_v32  ;;  %v4578_v22 = vadd.f32 %v6262_v1, %v6260_v54 }
 0x237   : > { %v3596_v40 = vsel %vm6046_vm14, %v3405_v20, %v4038_v5  ;;  %v3410_v4 = vrot.slane %v3408_v37, 7  ;;  %v4579_v36 = vadd.f32 %v6267_v19, %v6265_v29  ;;  %v4080_v51 = vpack.c.bf16 %v3016_v46, %v3016_v46  ;;  %v4051_v20 = vld [vmem:[%s5903_s4 + $0xc8] sm:$0x1] }
 0x238   : > { %4039 = vst [vmem:[%s5903_s4 + $0xa8] sm:$0xf] %v3596_v40  ;;  %v3385_v34 = vrot.slane %v3383_v2, 7  ;;  %v4085_v61 = vpack.c.bf16 %v3021_v38, %v3021_v38  ;;  %v3019_v9 = vmax.f32 %v2987_v26, 0.0  ;;  %v3406_v57 = vrot.slane %v3402_v33, 4 }
 0x239   : > { %v3413_v8 = vor.u32 %v3411_v15, %v3410_v4  ;;  %v3415_v13 = vrot.slane %v3410_v4, 4  ;;  %v3391_v24 = vshrl.u32 %v4080_v51, 16  ;;  %v3394_v3 = vshll.u32 %v4080_v51, 16  ;;  %v4046_v2 = vld [vmem:[%s5903_s4 + $0xbc] sm:$0x1] }
 0x23a   : > { %v3388_v47 = vor.u32 %v3386_v41, %v3385_v34  ;;  %v3434_v54 = vshrl.u32 %v4085_v61, 16  ;;  %v3437_v1 = vshll.u32 %v4085_v61, 16  ;;  %v4083_v21 = vpack.c.bf16 %v3019_v9, %v3019_v9 }
 0x23b   : > { %v3414_v19 = vsel %vm6055_vm15, %v3406_v57, %v3413_v8  ;;  %v3600_v23 = vsel %vm6061_vm0, %v3415_v13, %v4041_v42  ;;  %v3393_v30 = vrot.slane %v3391_v24, 7  ;;  %v2990_v59 = vadd.f32 %v4578_v22, %v6037_v32 }
 0x23c   : > { %v3589_v29 = vsel %vm6046_vm14, %v3388_v47, %v4033_v45  ;;  %4040 = vst.msk [vmem:[%s5903_s4 + $0xac] sm:$0xf] %vm3039_vm9, %v3414_v19  ;;  %4042 = vst [vmem:[%s5903_s4 + $0xb0] sm:$0x1] %v3600_v23  ;;  %v3436_v56 = vrot.slane %v3434_v54, 7  ;;  %v2988_v62 = vadd.f32 %v4579_v36, %v6037_v32  ;;  %v3417_v16 = vshrl.u32 %v4083_v21, 16 }
 0x23d   : > { %4034 = vst [vmem:[%s5903_s4 + $0x9c] sm:$0xf] %v3589_v29  ;;  %v3389_v6 = vrot.slane %v3385_v34, 4  ;;  %v3396_v60 = vor.u32 %v3394_v3, %v3393_v30  ;;  %v3398_v28 = vrot.slane %v3393_v30, 4  ;;  %v3420_v17 = vshll.u32 %v4083_v21, 16 }
 0x23e   : > { %v3439_v53 = vor.u32 %v3437_v1, %v3436_v56  ;;  %v3419_v27 = vrot.slane %v3417_v16, 7  ;;  %v3022_v44 = vmax.f32 %v2990_v59, 0.0  ;;  %v3020_v48 = vmax.f32 %v2988_v62, 0.0 }
 0x23f   : > { %v3397_v0 = vsel %vm6055_vm15, %v3389_v6, %v3396_v60  ;;  %v3593_v32 = vsel %vm6061_vm0, %v3398_v28, %v4036_v63  ;;  %v3440_v11 = vrot.slane %v3436_v56, 4 }
 0x240   : > { %v3610_v7 = vsel %vm6046_vm14, %v3439_v53, %v4048_v58  ;;  %4035 = vst.msk [vmem:[%s5903_s4 + $0xa0] sm:$0xf] %vm3039_vm9, %v3397_v0  ;;  %4037 = vst [vmem:[%s5903_s4 + $0xa4] sm:$0x1] %v3593_v32  ;;  %v3422_v18 = vor.u32 %v3420_v17, %v3419_v27  ;;  %v4086_v35 = vpack.c.bf16 %v3022_v44, %v3022_v44  ;;  %v3423_v12 = vrot.slane %v3419_v27, 4 }
 0x241   : > { %4049 = vst [vmem:[%s5903_s4 + $0xc0] sm:$0xf] %v3610_v7  ;;  %v4084_v55 = vpack.c.bf16 %v3020_v48, %v3020_v48 }
 0x242   : > { %v3603_v33 = vsel %vm6046_vm14, %v3422_v18, %v4043_v31  ;;  %v3442_v14 = vshrl.u32 %v4086_v35, 16  ;;  %v3445_v10 = vshll.u32 %v4086_v35, 16 }
 0x243   : > { %v3425_v5 = vshrl.u32 %v4084_v55, 16  ;;  %4044 = vst [vmem:[%s5903_s4 + $0xb4] sm:$0xf] %v3603_v33  ;;  %v3428_v49 = vshll.u32 %v4084_v55, 16 }
 0x244   : > { %v3444_v39 = vrot.slane %v3442_v14, 7 }
 0x245   : > { %v3427_v43 = vrot.slane %v3425_v5, 7 }
 0x246   : > { %v3447_v41 = vor.u32 %v3445_v10, %v3444_v39  ;;  %v3449_v37 = vrot.slane %v3444_v39, 4 }
 0x247   : > { %v3430_v15 = vor.u32 %v3428_v49, %v3427_v43  ;;  %v3432_v52 = vrot.slane %v3427_v43, 4 }
 0x248   : > { %v3448_v40 = vsel %vm6055_vm15, %v3440_v11, %v3447_v41  ;;  %v3614_v46 = vsel %vm6061_vm0, %v3449_v37, %v4051_v20 }
 0x249   : > { %v3431_v38 = vsel %vm6055_vm15, %v3423_v12, %v3430_v15  ;;  %v3607_v26 = vsel %vm6061_vm0, %v3432_v52, %v4046_v2  ;;  %4050 = vst.msk [vmem:[%s5903_s4 + $0xc4] sm:$0xf] %vm3039_vm9, %v3448_v40  ;;  %4052 = vst [vmem:[%s5903_s4 + $0xc8] sm:$0x1] %v3614_v46 }
 0x24a   : > { %4045 = vst.msk [vmem:[%s5903_s4 + $0xb8] sm:$0xf] %vm3039_vm9, %v3431_v38  ;;  %4047 = vst [vmem:[%s5903_s4 + $0xbc] sm:$0x1] %v3607_v26 }
 0x24b PF: > { %s13_s16 = sadd.s32 1, %s4907_s16   ;;  %s6483_s12 = smov %s4899_s14 }
 0x24c   : > { %p10_p7 = scmp.ge.s32.totalorder %s13_s16, 6   ;;  %s6484_s13 = smov %s4903_s15 }
 0x24d   : > { %s6485_s14 = smov %s6488_s17  ;;  %s6486_s15 = smov %s6492_s18 }
 0x24e   :  { %12 = sbr.rel (!%p10_p7) target bundleno = 3 (0x3), region = 69 }

</bundles_post_ra>
